<compile_context>
chip_gen: v6e
topology: v6e:2x2x1
jax: 0.10.0
libtpu: 0.0.40
codegen_flags: <defaults>
</compile_context>

<pallas_src>
import functools

import jax
import jax.numpy as jnp
from jax import lax
from jax.experimental import pallas as pl
from jax.experimental.pallas import tpu as pltpu

LEAKY_SLOPE = 0.2  # self.alpha of the GAT layer (LeakyReLU negative slope)


def _gat_kernel(alpha_ref, h_ref, w_ref, o_ref, *, num_heads, d,
                compute_softmax_factor):
    # alpha_ref: (1,) f32 in SMEM (ResidualWeight.alpha)
    # h_ref:     (Bt, N, F_in) f32 block (Bt batch elements per grid step)
    # w_ref:     (F_in, H*d) bf16 — all per-head nn.Linear weights (transposed) concatenated
    # o_ref:     (Bt, N, H*d) f32 output block (lane-dense write)
    Bt, N, F_in = h_ref.shape
    HD = w_ref.shape[1]

    h = h_ref[...].reshape(Bt * N, F_in)                               # (Bt*N, F_in) f32

    # One lane-dense projection for all heads & all Bt rows; bf16 operands feed the MXU at
    # full rate, accumulation stays f32.  Columns [hd*d:(hd+1)*d] == per-head Linear outputs.
    hp = jnp.dot(h.astype(jnp.bfloat16), w_ref[...],
                 preferred_element_type=jnp.float32)                   # (Bt*N, HD) f32

    if compute_softmax_factor:
        # Faithful (redundant) path: the PyTorch aggregation multiplies hp[b,i,:] by the
        # softmax row-sum (== 1 up to rounding).  Only (N,1) row-sums are kept per head;
        # they are broadcast to full width so the scaling is ONE lane-dense multiply.
        scale_rows = []
        for b in range(Bt):                      # Bt is small & static
            hp_b = hp[b * N:(b + 1) * N, :]                            # (N, HD)
            scale_cols = []
            for hd in range(num_heads):          # H is small & static
                hp_h = hp_b[:, hd * d:(hd + 1) * d]                    # (N, d) f32
                # e = hp_h @ hp_h^T (contract dim 1 of both operands, no explicit transpose).
                e = lax.dot_general(hp_h, hp_h, (((1,), (1,)), ((), ())),
                                    preferred_element_type=jnp.float32)  # (N, N)
                e = jnp.where(e > 0, e, LEAKY_SLOPE * e)               # LeakyReLU(0.2)
                e = e - jnp.max(e, axis=-1, keepdims=True)             # stable softmax
                p = jnp.exp(e)
                s = jnp.sum(p, axis=-1, keepdims=True)                 # (N, 1)
                rowsum = s * (1.0 / s)                                 # softmax row-sum (~1)
                scale_cols.append(jnp.broadcast_to(rowsum, (N, d)))    # lane broadcast
            scale_rows.append(jnp.concatenate(scale_cols, axis=-1))    # (N, HD)
        scale = jnp.concatenate(scale_rows, axis=0)                    # (Bt*N, HD)
        out = hp * scale                                               # single full-width mul
    else:
        # The softmax row-sum is identically 1, so the module's output is just hp.
        out = hp

    # Fused ResidualWeight: clamp(alpha) * output + (1 - alpha) * h
    alpha = jnp.clip(alpha_ref[0], 0.0, 1.0)
    res = alpha * out + (1.0 - alpha) * h                              # (Bt*N, HD)
    o_ref[...] = res.reshape(Bt, N, HD).astype(o_ref.dtype)


def multi_head_gat(h, adj, w_all, residual_alpha, *, num_heads,
                   batch_block=1, compute_softmax_factor=True):
    """h: (B, N, F_in) f32; adj: (B, N, N) (unused — drop_edge is identity and adj never
    enters the attention math); w_all: (F_in, H*d) concatenated per-head linear weights
    (already transposed, so h @ w_all == cat of the nn.Linear outputs); residual_alpha:
    scalar ResidualWeight.alpha (clamped inside the kernel)."""
    del adj
    B, N, F_in = h.shape
    F_in2, HD = w_all.shape
    assert F_in == F_in2
    assert HD % num_heads == 0
    d = HD // num_heads
    # The residual blend broadcasts output against h -> out_features must equal in_features.
    assert HD == F_in, "ResidualWeight requires out_features == in_features"
    assert B % batch_block == 0, "batch_block must divide the batch size"

    alpha_arr = jnp.asarray(residual_alpha, dtype=jnp.float32).reshape((1,))
    w_bf16 = w_all.astype(jnp.bfloat16)        # halve W DMA bytes / VMEM footprint

    kernel = functools.partial(_gat_kernel, num_heads=num_heads, d=d,
                               compute_softmax_factor=compute_softmax_factor)

    grid = (B // batch_block,)
    return pl.pallas_call(
        kernel,
        out_shape=jax.ShapeDtypeStruct((B, N, HD), h.dtype),
        grid_spec=pltpu.PrefetchScalarGridSpec(
            num_scalar_prefetch=0,
            grid=grid,
            in_specs=[
                pl.BlockSpec(memory_space=pltpu.MemorySpace.SMEM),        # alpha scalar
                pl.BlockSpec((batch_block, N, F_in), lambda i: (i, 0, 0)),  # h batch block
                pl.BlockSpec((F_in, HD), lambda i: (0, 0)),               # W: constant block
            ],
            out_specs=pl.BlockSpec((batch_block, N, HD), lambda i: (i, 0, 0)),
        ),
        compiler_params=pltpu.CompilerParams(
            dimension_semantics=("parallel",),
            vmem_limit_bytes=32 * 1024 * 1024),
    )(alpha_arr, h, w_bf16)


def reference_gat(h, w_all, residual_alpha, *, num_heads):
    """Pure-JAX mirror of the PyTorch forward, including its unsqueeze(2) broadcast."""
    B, N, F_in = h.shape
    d = w_all.shape[1] // num_heads
    outs = []
    for i in range(num_heads):
        hp = h @ w_all[:, i * d:(i + 1) * d]                       # (B, N, d)
        e = jnp.einsum("bnd,bmd->bnm", hp, hp)
        e = jnp.where(e > 0, e, LEAKY_SLOPE * e)
        attn = jax.nn.softmax(e, axis=2)
        hp_rep = jnp.broadcast_to(hp[:, :, None, :], (B, N, N, d))  # unsqueeze(2).repeat
        outs.append(jnp.sum(hp_rep * attn[..., None], axis=2))
    out = jnp.concatenate(outs, axis=-1)
    alpha = jnp.clip(residual_alpha, 0.0, 1.0)
    return alpha * out + (1.0 - alpha) * h


if __name__ == "__main__":
    # Small shapes consistent with the module; in_features == out_features so the residual
    # branch broadcasts like in PyTorch.
    B, N, F_in = 4, 64, 64
    num_heads = 4
    d = F_in // num_heads          # out_per_head = 16, out_features = 64 == in_features

    key = jax.random.PRNGKey(0)
    k_h, k_w, k_adj = jax.random.split(key, 3)

    h = jax.random.normal(k_h, (B, N, F_in), dtype=jnp.float32)
    adj = (jax.random.uniform(k_adj, (B, N, N)) > 0.5).astype(jnp.float32)  # unused, like the module
    # Deterministic init of the H linear layers (bias=False), concatenated as (F_in, H*d).
    # Round-trip through bf16 so the kernel's bf16 weight storage is lossless vs the reference.
    w_all = jax.random.normal(k_w, (F_in, num_heads * d), dtype=jnp.float32) / jnp.sqrt(F_in)
    w_all = w_all.astype(jnp.bfloat16).astype(jnp.float32)
    residual_alpha = jnp.float32(0.5)  # ResidualWeight(initial_alpha=0.5)

    ref = reference_gat(h, w_all, residual_alpha, num_heads=num_heads)

    # Faithful path (computes the redundant softmax row-sum factor, like the module).
    out = multi_head_gat(h, adj, w_all, residual_alpha, num_heads=num_heads,
                         batch_block=2, compute_softmax_factor=True)
    out = jax.block_until_ready(out)
    assert out.shape == (B, N, F_in)
    # Tolerance covers the bf16 cast of h for the projection matmul (the only precision
    # shortcut kept; the softmax factor and its reciprocal are now exact f32).
    assert jnp.allclose(out, ref, rtol=2e-2, atol=2e-2), "Pallas output mismatch vs reference"

    # Fast path: exploits softmax-row-sum == 1, skipping all O(H*N^2) work.
    out_fast = multi_head_gat(h, adj, w_all, residual_alpha, num_heads=num_heads,
                              batch_block=2, compute_softmax_factor=False)
    out_fast = jax.block_until_ready(out_fast)
    assert jnp.allclose(out_fast, ref, rtol=2e-2, atol=2e-2), "Fast-path mismatch vs reference"

    print("KERNEL_OK")
</pallas_src>

<mosaic_0001>
module attributes {stable_mosaic.version = 11 : i64} {
  func.func @_gat_kernel(%arg0: i32, %arg1: memref<1xf32, #tpu.memory_space<smem>>, %arg2: memref<2x64x64xf32, #tpu.memory_space<vmem>>, %arg3: memref<64x64xbf16, #tpu.memory_space<vmem>>, %arg4: memref<2x64x64xf32, #tpu.memory_space<vmem>>) attributes {dimension_semantics = [#tpu.dimension_semantics<parallel>], iteration_bounds = array<i64: 2>, scalar_prefetch = 0 : i64, scratch_operands = 0 : i64, tpu.core_type = #tpu.core_type<tc>, window_params = [{transform_indices = @transform_0, window_bounds = array<i64: 1>}, {transform_indices = @transform_1, window_bounds = array<i64: 2, 64, 64>}, {pipeline_mode = #tpu.pipeline_mode<synchronous>, transform_indices = @transform_2, window_bounds = array<i64: 64, 64>}, {transform_indices = @transform_3, window_bounds = array<i64: 2, 64, 64>}]} {
    %c0 = arith.constant 0 : index
    %c0_0 = arith.constant 0 : index
    %c0_1 = arith.constant 0 : index
    %0 = vector.load %arg2[%c0, %c0_0, %c0_1] : memref<2x64x64xf32, #tpu.memory_space<vmem>>, vector<2x64x64xf32>
    %1 = vector.shape_cast %0 : vector<2x64x64xf32> to vector<128x64xf32>
    %2 = arith.truncf %1 : vector<128x64xf32> to vector<128x64xbf16>
    %c0_2 = arith.constant 0 : index
    %c0_3 = arith.constant 0 : index
    %3 = vector.load %arg3[%c0_2, %c0_3] : memref<64x64xbf16, #tpu.memory_space<vmem>>, vector<64x64xbf16>
    %cst = arith.constant dense<0.000000e+00> : vector<128x64xf32>
    %4 = tpu.matmul %2, %3, %cst {dimension_numbers = #tpu.dot_dimension_numbers<[1], [0], [0], [1], [0, 0, 1, 1], [], []>} : vector<128x64xbf16>, vector<64x64xbf16>, vector<128x64xf32> -> vector<128x64xf32>
    %5 = vector.extract_strided_slice %4 {offsets = [0, 0], sizes = [64, 64], strides = [1, 1]} : vector<128x64xf32> to vector<64x64xf32>
    %6 = vector.extract_strided_slice %5 {offsets = [0, 0], sizes = [64, 16], strides = [1, 1]} : vector<64x64xf32> to vector<64x16xf32>
    %cst_4 = arith.constant dense<0.000000e+00> : vector<64x64xf32>
    %7 = tpu.matmul %6, %6, %cst_4 {dimension_numbers = #tpu.dot_dimension_numbers<[1], [1], [0], [0], [0, 0, 1, 0], [], []>} : vector<64x16xf32>, vector<64x16xf32>, vector<64x64xf32> -> vector<64x64xf32>
    %cst_5 = arith.constant 0.000000e+00 : f32
    %8 = vector.broadcast %cst_5 : f32 to vector<64x64xf32>
    %9 = arith.cmpf ogt, %7, %8 : vector<64x64xf32>
    %cst_6 = arith.constant 2.000000e-01 : f32
    %10 = vector.broadcast %cst_6 : f32 to vector<64x64xf32>
    %11 = arith.mulf %10, %7 : vector<64x64xf32>
    %12 = arith.select %9, %7, %11 : vector<64x64xi1>, vector<64x64xf32>
    %cst_7 = arith.constant dense<0xFF800000> : vector<64xf32>
    %13 = vector.multi_reduction <maximumf>, %12, %cst_7 [1] : vector<64x64xf32> to vector<64xf32>
    %14 = vector.shape_cast %13 : vector<64xf32> to vector<64x1xf32>
    %15 = vector.broadcast %14 : vector<64x1xf32> to vector<64x64xf32>
    %16 = arith.subf %12, %15 : vector<64x64xf32>
    %17 = math.exp %16 : vector<64x64xf32>
    %cst_8 = arith.constant dense<0.000000e+00> : vector<64xf32>
    %18 = vector.multi_reduction <add>, %17, %cst_8 [1] : vector<64x64xf32> to vector<64xf32>
    %19 = vector.shape_cast %18 : vector<64xf32> to vector<64x1xf32>
    %cst_9 = arith.constant 1.000000e+00 : f32
    %20 = vector.broadcast %cst_9 : f32 to vector<64x1xf32>
    %21 = arith.divf %20, %19 : vector<64x1xf32>
    %22 = arith.mulf %19, %21 : vector<64x1xf32>
    %23 = vector.shape_cast %22 : vector<64x1xf32> to vector<64x1xf32>
    %24 = vector.broadcast %23 : vector<64x1xf32> to vector<64x16xf32>
    %25 = vector.extract_strided_slice %5 {offsets = [0, 16], sizes = [64, 16], strides = [1, 1]} : vector<64x64xf32> to vector<64x16xf32>
    %cst_10 = arith.constant dense<0.000000e+00> : vector<64x64xf32>
    %26 = tpu.matmul %25, %25, %cst_10 {dimension_numbers = #tpu.dot_dimension_numbers<[1], [1], [0], [0], [0, 0, 1, 0], [], []>} : vector<64x16xf32>, vector<64x16xf32>, vector<64x64xf32> -> vector<64x64xf32>
    %cst_11 = arith.constant 0.000000e+00 : f32
    %27 = vector.broadcast %cst_11 : f32 to vector<64x64xf32>
    %28 = arith.cmpf ogt, %26, %27 : vector<64x64xf32>
    %cst_12 = arith.constant 2.000000e-01 : f32
    %29 = vector.broadcast %cst_12 : f32 to vector<64x64xf32>
    %30 = arith.mulf %29, %26 : vector<64x64xf32>
    %31 = arith.select %28, %26, %30 : vector<64x64xi1>, vector<64x64xf32>
    %cst_13 = arith.constant dense<0xFF800000> : vector<64xf32>
    %32 = vector.multi_reduction <maximumf>, %31, %cst_13 [1] : vector<64x64xf32> to vector<64xf32>
    %33 = vector.shape_cast %32 : vector<64xf32> to vector<64x1xf32>
    %34 = vector.broadcast %33 : vector<64x1xf32> to vector<64x64xf32>
    %35 = arith.subf %31, %34 : vector<64x64xf32>
    %36 = math.exp %35 : vector<64x64xf32>
    %cst_14 = arith.constant dense<0.000000e+00> : vector<64xf32>
    %37 = vector.multi_reduction <add>, %36, %cst_14 [1] : vector<64x64xf32> to vector<64xf32>
    %38 = vector.shape_cast %37 : vector<64xf32> to vector<64x1xf32>
    %cst_15 = arith.constant 1.000000e+00 : f32
    %39 = vector.broadcast %cst_15 : f32 to vector<64x1xf32>
    %40 = arith.divf %39, %38 : vector<64x1xf32>
    %41 = arith.mulf %38, %40 : vector<64x1xf32>
    %42 = vector.shape_cast %41 : vector<64x1xf32> to vector<64x1xf32>
    %43 = vector.broadcast %42 : vector<64x1xf32> to vector<64x16xf32>
    %44 = vector.extract_strided_slice %5 {offsets = [0, 32], sizes = [64, 16], strides = [1, 1]} : vector<64x64xf32> to vector<64x16xf32>
    %cst_16 = arith.constant dense<0.000000e+00> : vector<64x64xf32>
    %45 = tpu.matmul %44, %44, %cst_16 {dimension_numbers = #tpu.dot_dimension_numbers<[1], [1], [0], [0], [0, 0, 1, 0], [], []>} : vector<64x16xf32>, vector<64x16xf32>, vector<64x64xf32> -> vector<64x64xf32>
    %cst_17 = arith.constant 0.000000e+00 : f32
    %46 = vector.broadcast %cst_17 : f32 to vector<64x64xf32>
    %47 = arith.cmpf ogt, %45, %46 : vector<64x64xf32>
    %cst_18 = arith.constant 2.000000e-01 : f32
    %48 = vector.broadcast %cst_18 : f32 to vector<64x64xf32>
    %49 = arith.mulf %48, %45 : vector<64x64xf32>
    %50 = arith.select %47, %45, %49 : vector<64x64xi1>, vector<64x64xf32>
    %cst_19 = arith.constant dense<0xFF800000> : vector<64xf32>
    %51 = vector.multi_reduction <maximumf>, %50, %cst_19 [1] : vector<64x64xf32> to vector<64xf32>
    %52 = vector.shape_cast %51 : vector<64xf32> to vector<64x1xf32>
    %53 = vector.broadcast %52 : vector<64x1xf32> to vector<64x64xf32>
    %54 = arith.subf %50, %53 : vector<64x64xf32>
    %55 = math.exp %54 : vector<64x64xf32>
    %cst_20 = arith.constant dense<0.000000e+00> : vector<64xf32>
    %56 = vector.multi_reduction <add>, %55, %cst_20 [1] : vector<64x64xf32> to vector<64xf32>
    %57 = vector.shape_cast %56 : vector<64xf32> to vector<64x1xf32>
    %cst_21 = arith.constant 1.000000e+00 : f32
    %58 = vector.broadcast %cst_21 : f32 to vector<64x1xf32>
    %59 = arith.divf %58, %57 : vector<64x1xf32>
    %60 = arith.mulf %57, %59 : vector<64x1xf32>
    %61 = vector.shape_cast %60 : vector<64x1xf32> to vector<64x1xf32>
    %62 = vector.broadcast %61 : vector<64x1xf32> to vector<64x16xf32>
    %63 = vector.extract_strided_slice %5 {offsets = [0, 48], sizes = [64, 16], strides = [1, 1]} : vector<64x64xf32> to vector<64x16xf32>
    %cst_22 = arith.constant dense<0.000000e+00> : vector<64x64xf32>
    %64 = tpu.matmul %63, %63, %cst_22 {dimension_numbers = #tpu.dot_dimension_numbers<[1], [1], [0], [0], [0, 0, 1, 0], [], []>} : vector<64x16xf32>, vector<64x16xf32>, vector<64x64xf32> -> vector<64x64xf32>
    %cst_23 = arith.constant 0.000000e+00 : f32
    %65 = vector.broadcast %cst_23 : f32 to vector<64x64xf32>
    %66 = arith.cmpf ogt, %64, %65 : vector<64x64xf32>
    %cst_24 = arith.constant 2.000000e-01 : f32
    %67 = vector.broadcast %cst_24 : f32 to vector<64x64xf32>
    %68 = arith.mulf %67, %64 : vector<64x64xf32>
    %69 = arith.select %66, %64, %68 : vector<64x64xi1>, vector<64x64xf32>
    %cst_25 = arith.constant dense<0xFF800000> : vector<64xf32>
    %70 = vector.multi_reduction <maximumf>, %69, %cst_25 [1] : vector<64x64xf32> to vector<64xf32>
    %71 = vector.shape_cast %70 : vector<64xf32> to vector<64x1xf32>
    %72 = vector.broadcast %71 : vector<64x1xf32> to vector<64x64xf32>
    %73 = arith.subf %69, %72 : vector<64x64xf32>
    %74 = math.exp %73 : vector<64x64xf32>
    %cst_26 = arith.constant dense<0.000000e+00> : vector<64xf32>
    %75 = vector.multi_reduction <add>, %74, %cst_26 [1] : vector<64x64xf32> to vector<64xf32>
    %76 = vector.shape_cast %75 : vector<64xf32> to vector<64x1xf32>
    %cst_27 = arith.constant 1.000000e+00 : f32
    %77 = vector.broadcast %cst_27 : f32 to vector<64x1xf32>
    %78 = arith.divf %77, %76 : vector<64x1xf32>
    %79 = arith.mulf %76, %78 : vector<64x1xf32>
    %80 = vector.shape_cast %79 : vector<64x1xf32> to vector<64x1xf32>
    %81 = vector.broadcast %80 : vector<64x1xf32> to vector<64x16xf32>
    %82 = tpu.concatenate %24, %43, %62, %81 in 1 : vector<64x16xf32>, vector<64x16xf32>, vector<64x16xf32>, vector<64x16xf32> -> vector<64x64xf32>
    %83 = vector.extract_strided_slice %4 {offsets = [64, 0], sizes = [64, 64], strides = [1, 1]} : vector<128x64xf32> to vector<64x64xf32>
    %84 = vector.extract_strided_slice %83 {offsets = [0, 0], sizes = [64, 16], strides = [1, 1]} : vector<64x64xf32> to vector<64x16xf32>
    %cst_28 = arith.constant dense<0.000000e+00> : vector<64x64xf32>
    %85 = tpu.matmul %84, %84, %cst_28 {dimension_numbers = #tpu.dot_dimension_numbers<[1], [1], [0], [0], [0, 0, 1, 0], [], []>} : vector<64x16xf32>, vector<64x16xf32>, vector<64x64xf32> -> vector<64x64xf32>
    %cst_29 = arith.constant 0.000000e+00 : f32
    %86 = vector.broadcast %cst_29 : f32 to vector<64x64xf32>
    %87 = arith.cmpf ogt, %85, %86 : vector<64x64xf32>
    %cst_30 = arith.constant 2.000000e-01 : f32
    %88 = vector.broadcast %cst_30 : f32 to vector<64x64xf32>
    %89 = arith.mulf %88, %85 : vector<64x64xf32>
    %90 = arith.select %87, %85, %89 : vector<64x64xi1>, vector<64x64xf32>
    %cst_31 = arith.constant dense<0xFF800000> : vector<64xf32>
    %91 = vector.multi_reduction <maximumf>, %90, %cst_31 [1] : vector<64x64xf32> to vector<64xf32>
    %92 = vector.shape_cast %91 : vector<64xf32> to vector<64x1xf32>
    %93 = vector.broadcast %92 : vector<64x1xf32> to vector<64x64xf32>
    %94 = arith.subf %90, %93 : vector<64x64xf32>
    %95 = math.exp %94 : vector<64x64xf32>
    %cst_32 = arith.constant dense<0.000000e+00> : vector<64xf32>
    %96 = vector.multi_reduction <add>, %95, %cst_32 [1] : vector<64x64xf32> to vector<64xf32>
    %97 = vector.shape_cast %96 : vector<64xf32> to vector<64x1xf32>
    %cst_33 = arith.constant 1.000000e+00 : f32
    %98 = vector.broadcast %cst_33 : f32 to vector<64x1xf32>
    %99 = arith.divf %98, %97 : vector<64x1xf32>
    %100 = arith.mulf %97, %99 : vector<64x1xf32>
    %101 = vector.shape_cast %100 : vector<64x1xf32> to vector<64x1xf32>
    %102 = vector.broadcast %101 : vector<64x1xf32> to vector<64x16xf32>
    %103 = vector.extract_strided_slice %83 {offsets = [0, 16], sizes = [64, 16], strides = [1, 1]} : vector<64x64xf32> to vector<64x16xf32>
    %cst_34 = arith.constant dense<0.000000e+00> : vector<64x64xf32>
    %104 = tpu.matmul %103, %103, %cst_34 {dimension_numbers = #tpu.dot_dimension_numbers<[1], [1], [0], [0], [0, 0, 1, 0], [], []>} : vector<64x16xf32>, vector<64x16xf32>, vector<64x64xf32> -> vector<64x64xf32>
    %cst_35 = arith.constant 0.000000e+00 : f32
    %105 = vector.broadcast %cst_35 : f32 to vector<64x64xf32>
    %106 = arith.cmpf ogt, %104, %105 : vector<64x64xf32>
    %cst_36 = arith.constant 2.000000e-01 : f32
    %107 = vector.broadcast %cst_36 : f32 to vector<64x64xf32>
    %108 = arith.mulf %107, %104 : vector<64x64xf32>
    %109 = arith.select %106, %104, %108 : vector<64x64xi1>, vector<64x64xf32>
    %cst_37 = arith.constant dense<0xFF800000> : vector<64xf32>
    %110 = vector.multi_reduction <maximumf>, %109, %cst_37 [1] : vector<64x64xf32> to vector<64xf32>
    %111 = vector.shape_cast %110 : vector<64xf32> to vector<64x1xf32>
    %112 = vector.broadcast %111 : vector<64x1xf32> to vector<64x64xf32>
    %113 = arith.subf %109, %112 : vector<64x64xf32>
    %114 = math.exp %113 : vector<64x64xf32>
    %cst_38 = arith.constant dense<0.000000e+00> : vector<64xf32>
    %115 = vector.multi_reduction <add>, %114, %cst_38 [1] : vector<64x64xf32> to vector<64xf32>
    %116 = vector.shape_cast %115 : vector<64xf32> to vector<64x1xf32>
    %cst_39 = arith.constant 1.000000e+00 : f32
    %117 = vector.broadcast %cst_39 : f32 to vector<64x1xf32>
    %118 = arith.divf %117, %116 : vector<64x1xf32>
    %119 = arith.mulf %116, %118 : vector<64x1xf32>
    %120 = vector.shape_cast %119 : vector<64x1xf32> to vector<64x1xf32>
    %121 = vector.broadcast %120 : vector<64x1xf32> to vector<64x16xf32>
    %122 = vector.extract_strided_slice %83 {offsets = [0, 32], sizes = [64, 16], strides = [1, 1]} : vector<64x64xf32> to vector<64x16xf32>
    %cst_40 = arith.constant dense<0.000000e+00> : vector<64x64xf32>
    %123 = tpu.matmul %122, %122, %cst_40 {dimension_numbers = #tpu.dot_dimension_numbers<[1], [1], [0], [0], [0, 0, 1, 0], [], []>} : vector<64x16xf32>, vector<64x16xf32>, vector<64x64xf32> -> vector<64x64xf32>
    %cst_41 = arith.constant 0.000000e+00 : f32
    %124 = vector.broadcast %cst_41 : f32 to vector<64x64xf32>
    %125 = arith.cmpf ogt, %123, %124 : vector<64x64xf32>
    %cst_42 = arith.constant 2.000000e-01 : f32
    %126 = vector.broadcast %cst_42 : f32 to vector<64x64xf32>
    %127 = arith.mulf %126, %123 : vector<64x64xf32>
    %128 = arith.select %125, %123, %127 : vector<64x64xi1>, vector<64x64xf32>
    %cst_43 = arith.constant dense<0xFF800000> : vector<64xf32>
    %129 = vector.multi_reduction <maximumf>, %128, %cst_43 [1] : vector<64x64xf32> to vector<64xf32>
    %130 = vector.shape_cast %129 : vector<64xf32> to vector<64x1xf32>
    %131 = vector.broadcast %130 : vector<64x1xf32> to vector<64x64xf32>
    %132 = arith.subf %128, %131 : vector<64x64xf32>
    %133 = math.exp %132 : vector<64x64xf32>
    %cst_44 = arith.constant dense<0.000000e+00> : vector<64xf32>
    %134 = vector.multi_reduction <add>, %133, %cst_44 [1] : vector<64x64xf32> to vector<64xf32>
    %135 = vector.shape_cast %134 : vector<64xf32> to vector<64x1xf32>
    %cst_45 = arith.constant 1.000000e+00 : f32
    %136 = vector.broadcast %cst_45 : f32 to vector<64x1xf32>
    %137 = arith.divf %136, %135 : vector<64x1xf32>
    %138 = arith.mulf %135, %137 : vector<64x1xf32>
    %139 = vector.shape_cast %138 : vector<64x1xf32> to vector<64x1xf32>
    %140 = vector.broadcast %139 : vector<64x1xf32> to vector<64x16xf32>
    %141 = vector.extract_strided_slice %83 {offsets = [0, 48], sizes = [64, 16], strides = [1, 1]} : vector<64x64xf32> to vector<64x16xf32>
    %cst_46 = arith.constant dense<0.000000e+00> : vector<64x64xf32>
    %142 = tpu.matmul %141, %141, %cst_46 {dimension_numbers = #tpu.dot_dimension_numbers<[1], [1], [0], [0], [0, 0, 1, 0], [], []>} : vector<64x16xf32>, vector<64x16xf32>, vector<64x64xf32> -> vector<64x64xf32>
    %cst_47 = arith.constant 0.000000e+00 : f32
    %143 = vector.broadcast %cst_47 : f32 to vector<64x64xf32>
    %144 = arith.cmpf ogt, %142, %143 : vector<64x64xf32>
    %cst_48 = arith.constant 2.000000e-01 : f32
    %145 = vector.broadcast %cst_48 : f32 to vector<64x64xf32>
    %146 = arith.mulf %145, %142 : vector<64x64xf32>
    %147 = arith.select %144, %142, %146 : vector<64x64xi1>, vector<64x64xf32>
    %cst_49 = arith.constant dense<0xFF800000> : vector<64xf32>
    %148 = vector.multi_reduction <maximumf>, %147, %cst_49 [1] : vector<64x64xf32> to vector<64xf32>
    %149 = vector.shape_cast %148 : vector<64xf32> to vector<64x1xf32>
    %150 = vector.broadcast %149 : vector<64x1xf32> to vector<64x64xf32>
    %151 = arith.subf %147, %150 : vector<64x64xf32>
    %152 = math.exp %151 : vector<64x64xf32>
    %cst_50 = arith.constant dense<0.000000e+00> : vector<64xf32>
    %153 = vector.multi_reduction <add>, %152, %cst_50 [1] : vector<64x64xf32> to vector<64xf32>
    %154 = vector.shape_cast %153 : vector<64xf32> to vector<64x1xf32>
    %cst_51 = arith.constant 1.000000e+00 : f32
    %155 = vector.broadcast %cst_51 : f32 to vector<64x1xf32>
    %156 = arith.divf %155, %154 : vector<64x1xf32>
    %157 = arith.mulf %154, %156 : vector<64x1xf32>
    %158 = vector.shape_cast %157 : vector<64x1xf32> to vector<64x1xf32>
    %159 = vector.broadcast %158 : vector<64x1xf32> to vector<64x16xf32>
    %160 = tpu.concatenate %102, %121, %140, %159 in 1 : vector<64x16xf32>, vector<64x16xf32>, vector<64x16xf32>, vector<64x16xf32> -> vector<64x64xf32>
    %161 = tpu.concatenate %82, %160 in 0 : vector<64x64xf32>, vector<64x64xf32> -> vector<128x64xf32>
    %162 = arith.mulf %4, %161 : vector<128x64xf32>
    %c0_52 = arith.constant 0 : index
    %163 = memref.load %arg1[%c0_52] : memref<1xf32, #tpu.memory_space<smem>>
    %cst_53 = arith.constant 0.000000e+00 : f32
    %cst_54 = arith.constant 1.000000e+00 : f32
    %164 = arith.maximumf %cst_53, %163 : f32
    %165 = arith.minimumf %cst_54, %164 : f32
    %166 = vector.broadcast %165 : f32 to vector<128x64xf32>
    %167 = arith.mulf %166, %162 : vector<128x64xf32>
    %cst_55 = arith.constant 1.000000e+00 : f32
    %168 = arith.subf %cst_55, %165 : f32
    %169 = vector.broadcast %168 : f32 to vector<128x64xf32>
    %170 = arith.mulf %169, %1 : vector<128x64xf32>
    %171 = arith.addf %167, %170 : vector<128x64xf32>
    %172 = vector.shape_cast %171 : vector<128x64xf32> to vector<2x64x64xf32>
    %c0_56 = arith.constant 0 : index
    %c0_57 = arith.constant 0 : index
    %c0_58 = arith.constant 0 : index
    %173 = vector.load %arg4[%c0_56, %c0_57, %c0_58] : memref<2x64x64xf32, #tpu.memory_space<vmem>>, vector<2x64x64xf32>
    tpu.vector_store %arg4[%c0_56, %c0_57, %c0_58], %172 {strides = array<i32>} : memref<2x64x64xf32, #tpu.memory_space<vmem>>, vector<2x64x64xf32>,
    return
  }
  func.func @transform_0(%arg0: i32) -> i32 {
    %c0_i32 = arith.constant 0 : i32
    %c0_i32_0 = arith.constant 0 : i32
    return %c0_i32 : i32
  }
  func.func @transform_1(%arg0: i32) -> (i32, i32, i32) {
    %c0_i32 = arith.constant 0 : i32
    %c0_i32_0 = arith.constant 0 : i32
    %c0_i32_1 = arith.constant 0 : i32
    return %arg0, %c0_i32, %c0_i32_0 : i32, i32, i32
  }
  func.func @transform_2(%arg0: i32) -> (i32, i32) {
    %c0_i32 = arith.constant 0 : i32
    %c0_i32_0 = arith.constant 0 : i32
    %c0_i32_1 = arith.constant 0 : i32
    return %c0_i32, %c0_i32_0 : i32, i32
  }
  func.func @transform_3(%arg0: i32) -> (i32, i32, i32) {
    %c0_i32 = arith.constant 0 : i32
    %c0_i32_0 = arith.constant 0 : i32
    %c0_i32_1 = arith.constant 0 : i32
    return %arg0, %c0_i32, %c0_i32_0 : i32, i32, i32
  }
}

</mosaic_0001>

<bundles_post_ra>
// kernel: tpu_custom_call.1
= control target key start
LH: loop header
LB: loop body
LE: loop exit
PB: predicated region body
PF: predicated region fallthrough
CT: control target
= control target key end

     0   :  { %s5203_s0 = inlined_call_operand.<no memory space> [shape: f32[1], index: 0, kind: input, shape index: {}]   ;;  %s5204_s1 = inlined_call_operand.hbm [shape: f32[4,64,64], index: 1, kind: input, shape index: {}]   ;;  %s5205_s2 = inlined_call_operand.hbm [shape: bf16[64,64], index: 2, kind: input, shape index: {}]   ;;  %s5206_s3 = inlined_call_operand.hbm [shape: f32[4,64,64], index: 3, kind: output, shape index: {}]  }
   0x1   :  { %8 = sst [smem:[#allocation2]] %s5203_s0 }
   0x2   :  { %9 = vsyncpa [#allocation4], 0 }
   0x3   :  { %11 = vsyncpa [#allocation4 + $0x1], 0 }
   0x4   :  { %12 = vsyncpa [#allocation7], 0 }
   0x5   :  { %13 = vsyncpa [#allocation5], 0 }
   0x6   :  { %15 = vsyncpa [#allocation5 + $0x1], 0  ;;  %s3709_s14 = smov 0   ;;  %s3711_s15 = smov 0  }
   0x7   :  { %s3713_s16 = smov 0   ;;  %s3715_s17 = smov 0  }
   0x8 LB: > { %s3730_s0 = sadd.s32 4294967295, %s3670_s17   ;;  %s2662_s18 = sadd.s32 4294967294, %s3670_s17   ;;  %s3670_s17 = sphi %s3715_s17, %s5311_s17   ;;  %s3666_s16 = sphi %s3713_s16, %s5310_s16   ;;  %s3662_s15 = sphi %s3711_s15, %s5309_s15   ;;  %s3658_s14 = sphi %s3709_s14, %s5308_s14  }
   0x9   : > { %p62_p0 = scmp.ne.s32.totalorder %s3662_s15, %s3658_s14  ;;  %p5207_p1 = scmp.eq.s32.totalorder %s3730_s0, 0 }
   0xa   : > { %p113_p3 = scmp.eq.s32.totalorder %s2662_s18, 1  ;;  %p2663_p5 = scmp.ge.s32.totalorder %s3670_s17, 1 }
   0xb   : > { %p3739_p4 = por %p5207_p1, %p62_p0  ;;  %p120_p7 = scmp.lt.s32.totalorder %s3670_s17, 3 }
   0xc   : > { %p3744_p6 = por %p113_p3, %p62_p0  ;;  %s3672_s22 = smov [#allocation6]  }
   0xd   : > { %s5234_s19 = scalar_select %p3739_p4, 1, 0 }
   0xe   : > { %s5235_s20 = scalar_select %p3744_p6, 1, 0 }
   0xf   : > { %p3749_p8 = pnand %p2663_p5, %p120_p7  ;;  %s135_s23 = sshll.u32 %s3672_s22, 4  ;;  %s136_s23 = int_to_ptr.vmem [resolvable:$true] %s135_s23 }
  0x10   : > { %s3763_s25 = sadd.s32 1, %s3670_s17   ;;  %s49_s26 = sadd.s32 1, %s3666_s16 }
  0x11   : > { %s5236_s21 = scalar_select %p3749_p8, 1, 0 }
  0x12   : > { %p3220_p9 = pneg %p3749_p8  ;;  %s46_s27 = ssub.s32 %s3670_s17, %s3763_s25 }
  0x13   : > { %s3559_s28 = scalar_lea.vmem %s136_s23, 512  ;;  %p3567_p5 = scmp.lt.s32.totalorder %s136_s23, %s136_s23 }
  0x14   : > { %p3758_p11 = pnand %p3220_p9, %p5207_p1  ;;  %p3560_p13 = scmp.ne.s32.totalorder %s136_s23, %s3559_s28 }
  0x15   : > { %p3568_p7 = scmp.lt.s32.totalorder %s3559_s28, %s3559_s28 }
  0x16   : > { %p3550_p12 = pneg %p3758_p11 }
  0x17   : > { %p3569_p10 = por %p3568_p7, %p3567_p5 }
  0x18   : > { %p3562_p0 = pnand %p3560_p13, %p3550_p12 }
  0x1a   : > { %p3563_p3 = pneg %p3562_p0 }
  0x1c   : > { %p3570_p2 = pnand %p3569_p10, %p3563_p3 }
  0x1e   : > { %3573 = shalt.err (!%p3570_p2)
}
  0x1f   : > { %s3673_s29 = smov 64   ;;  %s3674_s30 = smov 4  }
  0x20   : > { %3223 = dma.hbm_to_vmem [thread:$0]  (!%p3758_p11), %s5205_s2, 512, %s136_s23, [#allocation7], %s3673_s29, %s3673_s29, %s3674_s30  }
  0x21   : > { %p47_p9 = scmp.eq.s32.totalorder %s46_s27, 0  ;;  %p56_p12 = scmp.ne.s32.totalorder %s3666_s16, %s3662_s15 }
  0x22   : > { %p57_p10 = scmp.eq.s32.totalorder %s3670_s17, 0  ;;  %p3233_p2 = scmp.lt.s32.totalorder %s3670_s17, 2 }
  0x23   : > { %s3780_s6 = scalar_select %p47_p9, %s3666_s16, %s49_s26  }
  0x24   : > { %p58_p13 = por %p57_p10, %p56_p12  ;;  %p5238_p0 = scmp.eq.s32.totalorder %s3730_s0, 1 }
  0x25   : > { %s149_s8 = sand.u32 1, %s3666_s16   ;;  %s2821_s9 = sshll.u32 %s3670_s17, 11 }
  0x26   : > { %p3784_p3 = por %p5238_p0, %p56_p12  ;;  %s2666_s10 = sshll.u32 %s149_s8, 7 }
  0x27   : > { %s3793_s13 = scalar_lea.hbm %s5204_s1, %s2821_s9  ;;  %s153_s18 = scalar_lea.vmem [#allocation3], %s2666_s10 }
  0x28   : > { %s5239_s7 = scalar_select %p3784_p3, 1, 0 }
  0x29   : > { %s161_s22 = sshll.u32 %s153_s18, 4  ;;  %p3795_p11 = pnand %p3233_p2, %p58_p13  ;;  %s3799_s22 = int_to_ptr.vmem [resolvable:$true] %s161_s22 }
  0x2a   : > { %s3801_s24 = scalar_lea.sflag [#allocation4], %s149_s8  ;;  %s3574_s26 = scalar_lea.hbm %s3793_s13, 2048 }
  0x2b   : > { %p3575_p5 = scmp.ne.s32.totalorder %s3793_s13, %s3574_s26  ;;  %p3576_p7 = pneg %p3795_p11 }
  0x2c   : > { %s3579_s29 = scalar_lea.hbm %s5204_s1, 4096  ;;  %p3580_p10 = scmp.lt.s32.totalorder %s3793_s13, %s5204_s1 }
  0x2d   : > { %p3577_p9 = pnand %p3576_p7, %p3575_p5  ;;  %p3581_p2 = scmp.lt.s32.totalorder %s3579_s29, %s3574_s26 }
  0x2f   : > { %p3578_p12 = pneg %p3577_p9  ;;  %p3582_p13 = por %p3581_p2, %p3580_p10 }
  0x31   : > { %p3583_p0 = pnand %p3582_p13, %p3578_p12 }
  0x33   : > { %3586 = shalt.err (!%p3583_p0)
}
  0x34   : > { %s3587_s5 = scalar_lea.vmem %s3799_s22, 2048  ;;  %s3675_s8 = smov [#allocation3]  }
  0x35   : > { %p3588_p1 = scmp.ne.s32.totalorder %s3799_s22, %s3587_s5  ;;  %s3592_s9 = sshll.u32 %s3675_s8, 4  ;;  %s3593_s9 = int_to_ptr.vmem [resolvable:$false] %s3592_s9 }
  0x36   : > { %s3594_s10 = scalar_lea.vmem %s3593_s9, 4096  ;;  %p3595_p9 = scmp.lt.s32.totalorder %s3799_s22, %s3593_s9 }
  0x37   : > { %p3590_p6 = pnand %p3588_p1, %p3576_p7  ;;  %p3596_p3 = scmp.lt.s32.totalorder %s3594_s10, %s3587_s5 }
  0x39   : > { %p3591_p5 = pneg %p3590_p6  ;;  %p3597_p4 = por %p3596_p3, %p3595_p9 }
  0x3b   : > { %p3598_p8 = pnand %p3597_p4, %p3591_p5 }
  0x3d   : > { %3601 = shalt.err (!%p3598_p8)
}
  0x3e   : > { %s3676_s11 = smov 128   ;;  %s3677_s12 = smov 8  }
  0x3f   : > { %3227 = dma.hbm_to_vmem [thread:$0]  (!%p3795_p11), %s3793_s13, 2048, %s3799_s22, %s3801_s24, %s3676_s11, %s3676_s11, %s3677_s12  }
  0x40   : > { %p5241_p1 = scmp.ne.s32.totalorder %s5236_s21, 0 }
  0x42   : > { %173 = sbr.rel (%p5241_p1) target bundleno = 1115 (0x45b), region = 32 }
  0x47   : > { %s3825_s18 = sand.u32 1, %s3662_s15   ;;  %p5242_p4 = scmp.ne.s32.totalorder %s5234_s19, 0 }
  0x48   : > { %s2671_s26 = sshll.u32 %s3825_s18, 7  ;;  %s176_s27 = scalar_lea.sflag [#allocation4], %s3825_s18 }
  0x49   : > { %s3831_s28 = scalar_lea.vmem [#allocation3], %s2671_s26 }
  0x4a   : > { %3645 = dma.done.wait (%p5242_p4), %s176_s27, 2048  }
  0x4b   : > { %3647 = vsyncadd (%p5242_p4), %s176_s27, 4294965248  ;;  %p5243_p6 = scmp.eq.s32.totalorder %s3730_s0, 0 }
  0x4d   : > { %3649 = dma.done.wait (%p5243_p6), [#allocation7], 512   ;;  %p5244_p8 = pmov %p5243_p6 }
  0x4e   : > { %s2494_s21 = sld [smem:[#allocation2]]  ;;  %v3280_v0 = vld [vmem:[#allocation6 + $0x18] sm:$0xff]   ;;  %s3678_s13 = smov 0.0   ;;  %v3281_v1 = vld [vmem:[#allocation6 + $0x10] sm:$0xff]   ;;  %v3282_v2 = vld [vmem:[#allocation6 + $0x8] sm:$0xff]   ;;  %vm265_vm0 = vcmask 523264  }
  0x4f   : > { %3651 = vsyncadd (%p5244_p8), [#allocation7], 4294966784  ;;  %s3679_s23 = smov 1.0   ;;  %2964 = vmatprep.subr.bf16.mxu0 %v3280_v0  ;;  %v209_v3 = vld [vmem:[%s3831_s28] sm:$0xff]  ;;  %v210_v4 = vld [vmem:[%s3831_s28 + $0x8] sm:$0xff]  ;;  %vm387_vm1 = vcmask 130048  }
  0x50   : > { %2965 = vmatpush3.bf16.msra.mxu0 %v3280_v0  ;;  %v225_v5 = vpack.c.bf16 %v210_v4, %v209_v3  ;;  %v217_v7 = vld [vmem:[%s3831_s28 + $0x40] sm:$0xff]  ;;  %v218_v8 = vld [vmem:[%s3831_s28 + $0x48] sm:$0xff]  ;;  %v219_v12 = vld [vmem:[%s3831_s28 + $0x50] sm:$0xff]  ;;  %s3680_s29 = smov 112   ;;  %s3681_s30 = smov 96  }
  0x51   : > { %2966 = vmatprep.subr.bf16.mxu0 %v3281_v1  ;;  %v3283_v9 = vld [vmem:[#allocation6] sm:$0xff]   ;;  %v220_v13 = vld [vmem:[%s3831_s28 + $0x58] sm:$0xff]  ;;  %v222_v17 = vld [vmem:[%s3831_s28 + $0x68] sm:$0xff]  ;;  %v229_v33 = vpack.c.bf16 %v218_v8, %v217_v7  ;;  %s3682_s4 = smov 80   ;;  %s4902_s5 = scalar_lea.vmem [#allocation8], %s2671_s26 }
  0x52   : > { %2972 = vmatprep.mubr.msk.bf16.mxu0 %vm265_vm0, %v225_v5  ;;  %v221_v16 = vld [vmem:[%s3831_s28 + $0x60] sm:$0xff]  ;;  %v223_v18 = vld [vmem:[%s3831_s28 + $0x70] sm:$0xff]  ;;  %v224_v21 = vld [vmem:[%s3831_s28 + $0x78] sm:$0xff]  ;;  %v230_v34 = vpack.c.bf16 %v220_v13, %v219_v12  ;;  %s2823_s8 = sshll.u32 %s3730_s0, 11  ;;  %s2579_s9 = sshll.u32 %s4902_s5, 4  ;;  %s5155_s9 = int_to_ptr.vmem [resolvable:$true] %s2579_s9 }
  0x53   : > { %v211_v23 = vld [vmem:[%s3831_s28 + $0x10] sm:$0xff]  ;;  %v212_v24 = vld [vmem:[%s3831_s28 + $0x18] sm:$0xff]  ;;  %v213_v26 = vld [vmem:[%s3831_s28 + $0x20] sm:$0xff]  ;;  %v231_v35 = vpack.c.bf16 %v222_v17, %v221_v16  ;;  %v232_v36 = vpack.c.bf16 %v224_v21, %v223_v18  ;;  %s5153_s12 = scalar_lea.hbm %s5206_s3, %s2823_s8  ;;  %s2565_s0 = scalar_lea.sflag [#allocation5], %s3825_s18 }
  0x54   : > { %s2495_s22 = smax.f32 %s3678_s13, %s2494_s21  ;;  %2967 = vmatpush3.bf16.msra.mxu0 %v3281_v1  ;;  %v214_v27 = vld [vmem:[%s3831_s28 + $0x28] sm:$0xff]  ;;  %v226_v28 = vpack.c.bf16 %v212_v24, %v211_v23  ;;  %v215_v30 = vld [vmem:[%s3831_s28 + $0x30] sm:$0xff]  ;;  %v216_v31 = vld [vmem:[%s3831_s28 + $0x38] sm:$0xff]  ;;  %s3602_s26 = scalar_lea.vmem %s5155_s9, 2048 }
  0x55   : > { %s3841_s24 = smin.f32 %s3679_s23, %s2495_s22  ;;  %2968 = vmatprep.subr.bf16.mxu0 %v3282_v2  ;;  %v227_v29 = vpack.c.bf16 %v214_v27, %v213_v26  ;;  %v228_v32 = vpack.c.bf16 %v216_v31, %v215_v30  ;;  %p3603_p3 = scmp.ne.s32.totalorder %s5155_s9, %s3602_s26 }
  0x56   : > { %s2514_s19 = ssub.f32 1.0, %s3841_s24  ;;  %p5305_p11 = scmp.ne.s32.totalorder %s5239_s7, 0 }
  0x57   : > { %s3683_s27 = smov [#allocation8]  }
  0x58   : > { %v3847_v6 = vstv %s2514_s19  ;;  %2969 = vmatpush3.bf16.msra.mxu0 %v3282_v2  ;;  %p3604_p7 = pnand %p3603_p3, %p5305_p11 }
  0x59   : > { %5245 = vst [vmem:[#allocation12_spill] sm:$0xff] %v3847_v6  ;;  %v3852_v10 = vmul.f32 %v3847_v6, %v217_v7  ;;  %v3855_v11 = vmul.f32 %v3847_v6, %v218_v8  ;;  %v3860_v14 = vmul.f32 %v3847_v6, %v219_v12  ;;  %v3863_v15 = vmul.f32 %v3847_v6, %v220_v13 }
  0x5a   : > { %v3869_v19 = vmul.f32 %v3847_v6, %v221_v16  ;;  %v3872_v20 = vmul.f32 %v3847_v6, %v222_v17  ;;  %v3876_v22 = vmul.f32 %v3847_v6, %v223_v18  ;;  %v3881_v25 = vmul.f32 %v3847_v6, %v224_v21  ;;  %2970 = vmatprep.subr.bf16.mxu0 %v3283_v9  ;;  %p3605_p12 = pneg %p3604_p7 }
  0x5b   : > { %5246 = vst [vmem:[#allocation13_spill] sm:$0xff] %v3852_v10  ;;  %5247 = vst [vmem:[#allocation14_spill] sm:$0xff] %v3855_v11 }
  0x5c   : > { %5248 = vst [vmem:[#allocation15_spill] sm:$0xff] %v3860_v14  ;;  %5249 = vst [vmem:[#allocation16_spill] sm:$0xff] %v3863_v15  ;;  %2971 = vmatpush3.bf16.msra.mxu0 %v3283_v9 }
  0x5d   : > { %5250 = vst [vmem:[#allocation17_spill] sm:$0xff] %v3869_v19  ;;  %5251 = vst [vmem:[#allocation18_spill] sm:$0xff] %v3872_v20 }
  0x5e   : > { %5252 = vst [vmem:[#allocation19_spill] sm:$0xff] %v3876_v22  ;;  %5253 = vst [vmem:[#allocation20_spill] sm:$0xff] %v3881_v25 }
  0x5f   : > { %2973 = vmatmul.mubr.msk.bf16.vlgmr.msra.gmra.mxu0 %vm265_vm0, %v226_v28 }
  0x60   : > { %2976 = vmatprep.mubr.msk.bf16.mxu0 %vm265_vm0, %v227_v29 }
  0x67   : > { %2977 = vmatmul.mubr.msk.bf16.gmra.mxu0 %vm265_vm0, %v228_v32 }
  0x68   : > { %2980 = vmatprep.mubr.msk.bf16.mxu0 %vm265_vm0, %v229_v33 }
  0x6f   : > { %2981 = vmatmul.mubr.msk.bf16.gmra.mxu0 %vm265_vm0, %v230_v34 }
  0x70   : > { %2984 = vmatprep.mubr.msk.bf16.mxu0 %vm265_vm0, %v231_v35 }
  0x77   : > { %2985 = vmatmul.mubr.msk.bf16.gmra.mxu0 %vm265_vm0, %v232_v36 }
 0x11f   : > { %v3894_v37 = vpop.f32.mrf.mxu0 }
 0x120   : > { %5254 = vst [vmem:[#allocation21_spill] sm:$0xff] %v3894_v37 }
 0x121   : > { %v3896_v38 = vpop.f32.mrf.mxu0 }
 0x122   : > { %5255 = vst [vmem:[#allocation22_spill] sm:$0xff] %v3896_v38  ;;  %3004 = vmatprep.mubr.msk.f32.mxu1 %vm387_vm1, %v3896_v38 }
 0x123   : > { %v3900_v39 = vpop.f32.mrf.mxu0 }
 0x124   : > { %5256 = vst [vmem:[#allocation23_spill] sm:$0xff] %v3900_v39 }
 0x125   : > { %v3902_v40 = vpop.f32.mrf.mxu0 }
 0x126   : > { %5257 = vst [vmem:[#allocation24_spill] sm:$0xff] %v3902_v40 }
 0x127   : > { %v3904_v41 = vpop.f32.mrf.mxu0 }
 0x128   : > { %5258 = vst [vmem:[#allocation25_spill] sm:$0xff] %v3904_v41 }
 0x129   : > { %v3906_v42 = vpop.f32.mrf.mxu0 }
 0x12a   : > { %5259 = vst [vmem:[#allocation26_spill] sm:$0xff] %v3906_v42 }
 0x12b   : > { %v3908_v43 = vpop.f32.mrf.mxu0 }
 0x12c   : > { %5260 = vst [vmem:[#allocation27_spill] sm:$0xff] %v3908_v43  ;;  %651 = vrot.lane.b32.xlu0 %v3908_v43, %s3680_s29  ;;  %2988 = vmatprep.subr.msk.mxu1 %vm387_vm1, %v3908_v43 }
 0x12d   : > { %v3914_v44 = vpop.f32.mrf.mxu0  ;;  %2989 = vmatpush3.xpose.msk.msra.mxu1 %vm387_vm1, %v3908_v43 }
 0x12e   : > { %5261 = vst [vmem:[#allocation28_spill] sm:$0xff] %v3914_v44  ;;  %2990 = vmatprep.subr.msk.mxu1 %vm387_vm1, %v3904_v41  ;;  %647 = vrot.lane.b32.xlu1 %v3914_v44, %s3680_s29 }
 0x12f   : > { %v3958_v45 = vpop.f32.mrf.mxu0 }
 0x130   : > { %649 = vrot.lane.b32.xlu0 %v3904_v41, %s3680_s29  ;;  %5262 = vst [vmem:[#allocation29_spill] sm:$0xff] %v3958_v45 }
 0x131   : > { %2991 = vmatpush3.xpose.msk.msra.mxu1 %vm387_vm1, %v3904_v41  ;;  %v3968_v46 = vpop.f32.mrf.mxu0 }
 0x132   : > { %645 = vrot.lane.b32.xlu1 %v3906_v42, %s3680_s29  ;;  %2992 = vmatprep.subr.msk.mxu1 %vm387_vm1, %v3914_v44  ;;  %5263 = vst [vmem:[#allocation30_spill] sm:$0xff] %v3968_v46 }
 0x133   : > { %v3978_v47 = vpop.f32.mrf.mxu0 }
 0x134   : > { %643 = vrot.lane.b32.xlu0 %v3900_v39, %s3680_s29  ;;  %5264 = vst [vmem:[#allocation31_spill] sm:$0xff] %v3978_v47 }
 0x135   : > { %2993 = vmatpush3.xpose.msk.msra.mxu1 %vm387_vm1, %v3914_v44  ;;  %v3988_v48 = vpop.f32.mrf.mxu0 }
 0x136   : > { %641 = vrot.lane.b32.xlu1 %v3894_v37, %s3680_s29  ;;  %2994 = vmatprep.subr.msk.mxu1 %vm387_vm1, %v3906_v42  ;;  %5265 = vst [vmem:[#allocation32_spill] sm:$0xff] %v3988_v48 }
 0x137   : > { %v3998_v49 = vpop.f32.mrf.mxu0 }
 0x138   : > { %639 = vrot.lane.b32.xlu0 %v3902_v40, %s3680_s29  ;;  %5266 = vst [vmem:[#allocation33_spill] sm:$0xff] %v3998_v49 }
 0x139   : > { %2995 = vmatpush3.xpose.msk.msra.mxu1 %vm387_vm1, %v3906_v42  ;;  %v4008_v50 = vpop.f32.mrf.mxu0 }
 0x13a   : > { %637 = vrot.lane.b32.xlu1 %v3896_v38, %s3680_s29  ;;  %2996 = vmatprep.subr.msk.mxu1 %vm387_vm1, %v3900_v39  ;;  %5267 = vst [vmem:[#allocation34_spill] sm:$0xff] %v4008_v50 }
 0x13b   : > { %v4016_v51 = vpop.f32.mrf.mxu0 }
 0x13c   : > { %908 = vrot.lane.b32.xlu0 %v3908_v43, %s3681_s30  ;;  %5268 = vst [vmem:[#allocation35_spill] sm:$0xff] %v4016_v51 }
 0x13d   : > { %2997 = vmatpush3.xpose.msk.msra.mxu1 %vm387_vm1, %v3900_v39  ;;  %v4022_v52 = vpop.f32.mrf.mxu0 }
 0x13e   : > { %1165 = vrot.lane.b32.xlu1 %v3908_v43, %s3682_s4  ;;  %2998 = vmatprep.subr.msk.mxu1 %vm387_vm1, %v3894_v37  ;;  %5269 = vst [vmem:[#allocation36_spill] sm:$0xff] %v4022_v52 }
 0x140   : > { %906 = vrot.lane.b32.xlu0 %v3904_v41, %s3681_s30 }
 0x141   : > { %2999 = vmatpush3.xpose.msk.msra.mxu1 %vm387_vm1, %v3894_v37 }
 0x142   : > { %1163 = vrot.lane.b32.xlu1 %v3904_v41, %s3682_s4  ;;  %3000 = vmatprep.subr.msk.mxu1 %vm387_vm1, %v3902_v40 }
 0x144   : > { %904 = vrot.lane.b32.xlu0 %v3914_v44, %s3681_s30 }
 0x145   : > { %3001 = vmatpush3.xpose.msk.msra.mxu1 %vm387_vm1, %v3902_v40 }
 0x146   : > { %1161 = vrot.lane.b32.xlu1 %v3914_v44, %s3682_s4  ;;  %3002 = vmatprep.subr.msk.mxu1 %vm387_vm1, %v3896_v38 }
 0x148   : > { %902 = vrot.lane.b32.xlu0 %v3906_v42, %s3681_s30 }
 0x149   : > { %3003 = vmatpush3.xpose.msk.msra.mxu1 %vm387_vm1, %v3896_v38 }
 0x14a   : > { %1159 = vrot.lane.b32.xlu1 %v3906_v42, %s3682_s4 }
 0x14c   : > { %900 = vrot.lane.b32.xlu0 %v3900_v39, %s3681_s30  ;;  %3005 = vmatmul.mubr.msk.f32.vlgmr.msra.gmra.mxu1 %vm387_vm1, %v3902_v40 }
 0x14d   : > { %3007 = vmatprep.mubr.msk.f32.mxu1 %vm387_vm1, %v3894_v37 }
 0x14e   : > { %1157 = vrot.lane.b32.xlu1 %v3900_v39, %s3682_s4 }
 0x150   : > { %898 = vrot.lane.b32.xlu0 %v3894_v37, %s3681_s30  ;;  %3008 = vmatmul.mubr.msk.f32.gmra.mxu1 %vm387_vm1, %v3900_v39 }
 0x151   : > { %3010 = vmatprep.mubr.msk.f32.mxu1 %vm387_vm1, %v3906_v42 }
 0x152   : > { %1155 = vrot.lane.b32.xlu1 %v3894_v37, %s3682_s4 }
 0x154   : > { %896 = vrot.lane.b32.xlu0 %v3902_v40, %s3681_s30  ;;  %3011 = vmatmul.mubr.msk.f32.gmra.mxu1 %vm387_vm1, %v3914_v44 }
 0x155   : > { %3013 = vmatprep.mubr.msk.f32.mxu1 %vm387_vm1, %v3904_v41 }
 0x156   : > { %1153 = vrot.lane.b32.xlu1 %v3902_v40, %s3682_s4 }
 0x158   : > { %894 = vrot.lane.b32.xlu0 %v3896_v38, %s3681_s30  ;;  %3014 = vmatmul.mubr.msk.f32.gmra.mxu1 %vm387_vm1, %v3908_v43 }
 0x15a   : > { %1151 = vrot.lane.b32.xlu1 %v3896_v38, %s3682_s4 }
 0x15c   : > { %1697 = vrot.lane.b32.xlu0 %v4016_v51, %s3680_s29 }
 0x15e   : > { %1695 = vrot.lane.b32.xlu1 %v3998_v49, %s3680_s29 }
 0x160   : > { %1693 = vrot.lane.b32.xlu0 %v4022_v52, %s3680_s29 }
 0x162   : > { %1691 = vrot.lane.b32.xlu1 %v4008_v50, %s3680_s29 }
 0x164   : > { %1689 = vrot.lane.b32.xlu0 %v3978_v47, %s3680_s29 }
 0x166   : > { %1687 = vrot.lane.b32.xlu1 %v3958_v45, %s3680_s29 }
 0x168   : > { %1685 = vrot.lane.b32.xlu0 %v3988_v48, %s3680_s29 }
 0x16a   : > { %1683 = vrot.lane.b32.xlu1 %v3968_v46, %s3680_s29 }
 0x16c   : > { %1954 = vrot.lane.b32.xlu0 %v4016_v51, %s3681_s30 }
 0x16e   : > { %2211 = vrot.lane.b32.xlu1 %v4016_v51, %s3682_s4 }
 0x170   : > { %1952 = vrot.lane.b32.xlu0 %v3998_v49, %s3681_s30 }
 0x172   : > { %2209 = vrot.lane.b32.xlu1 %v3998_v49, %s3682_s4 }
 0x174   : > { %1950 = vrot.lane.b32.xlu0 %v4022_v52, %s3681_s30 }
 0x176   : > { %2207 = vrot.lane.b32.xlu1 %v4022_v52, %s3682_s4 }
 0x178   : > { %1948 = vrot.lane.b32.xlu0 %v4008_v50, %s3681_s30 }
 0x17a   : > { %2205 = vrot.lane.b32.xlu1 %v4008_v50, %s3682_s4 }
 0x17c   : > { %1946 = vrot.lane.b32.xlu0 %v3978_v47, %s3681_s30 }
 0x17e   : > { %2203 = vrot.lane.b32.xlu1 %v3978_v47, %s3682_s4 }
 0x180   : > { %1944 = vrot.lane.b32.xlu0 %v3958_v45, %s3681_s30 }
 0x182   : > { %2201 = vrot.lane.b32.xlu1 %v3958_v45, %s3682_s4 }
 0x184   : > { %1942 = vrot.lane.b32.xlu0 %v3988_v48, %s3681_s30 }
 0x186   : > { %2199 = vrot.lane.b32.xlu1 %v3988_v48, %s3682_s4 }
 0x188   : > { %1940 = vrot.lane.b32.xlu0 %v3968_v46, %s3681_s30 }
 0x18a   : > { %2197 = vrot.lane.b32.xlu1 %v3968_v46, %s3682_s4 }
 0x19e   : > { %v4070_v53 = vpop.permute.xlu0 %651 }
 0x19f   : > { %3016 = vmatprep.subr.msk.mxu0 %vm387_vm1, %v4070_v53 }
 0x1a0   : > { %3017 = vmatpush3.xpose.msk.msra.mxu0 %vm387_vm1, %v4070_v53  ;;  %v648_v54 = vpop.permute.xlu1 %647 }
 0x1a2   : > { %v650_v55 = vpop.permute.xlu0 %649 }
 0x1a3   : > { %3018 = vmatprep.subr.msk.mxu0 %vm387_vm1, %v650_v55 }
 0x1a4   : > { %3019 = vmatpush3.xpose.msk.msra.mxu0 %vm387_vm1, %v650_v55  ;;  %v646_v56 = vpop.permute.xlu1 %645 }
 0x1a5   : > { %3020 = vmatprep.subr.msk.mxu0 %vm387_vm1, %v648_v54 }
 0x1a6   : > { %v644_v57 = vpop.permute.xlu0 %643 }
 0x1a8   : > { %3021 = vmatpush3.xpose.msk.msra.mxu0 %vm387_vm1, %v648_v54  ;;  %v642_v58 = vpop.permute.xlu1 %641 }
 0x1a9   : > { %3022 = vmatprep.subr.msk.mxu0 %vm387_vm1, %v646_v56 }
 0x1aa   : > { %v640_v59 = vpop.permute.xlu0 %639 }
 0x1ac   : > { %3023 = vmatpush3.xpose.msk.msra.mxu0 %vm387_vm1, %v646_v56  ;;  %v638_v60 = vpop.permute.xlu1 %637 }
 0x1ad   : > { %3024 = vmatprep.subr.msk.mxu0 %vm387_vm1, %v644_v57  ;;  %3032 = vmatprep.mubr.msk.f32.mxu0 %vm387_vm1, %v638_v60 }
 0x1ae   : > { %v4084_v61 = vpop.permute.xlu0 %908 }
 0x1af   : > { %3044 = vmatprep.subr.msk.mxu1 %vm387_vm1, %v4084_v61 }
 0x1b0   : > { %3025 = vmatpush3.xpose.msk.msra.mxu0 %vm387_vm1, %v644_v57  ;;  %v4089_v62 = vpop.permute.xlu1 %1165  ;;  %3045 = vmatpush3.xpose.msk.msra.mxu1 %vm387_vm1, %v4084_v61 }
 0x1b1   : > { %3026 = vmatprep.subr.msk.mxu0 %vm387_vm1, %v642_v58 }
 0x1b2   : > { %v4094_v63 = vpop.permute.xlu0 %906 }
 0x1b3   : > { %3046 = vmatprep.subr.msk.mxu1 %vm387_vm1, %v4094_v63 }
 0x1b4   : > { %3027 = vmatpush3.xpose.msk.msra.mxu0 %vm387_vm1, %v642_v58  ;;  %v4099_v0 = vpop.permute.xlu1 %1163  ;;  %3047 = vmatpush3.xpose.msk.msra.mxu1 %vm387_vm1, %v4094_v63 }
 0x1b5   : > { %3028 = vmatprep.subr.msk.mxu0 %vm387_vm1, %v640_v59 }
 0x1b6   : > { %v4104_v1 = vpop.permute.xlu0 %904 }
 0x1b7   : > { %3048 = vmatprep.subr.msk.mxu1 %vm387_vm1, %v4104_v1 }
 0x1b8   : > { %3029 = vmatpush3.xpose.msk.msra.mxu0 %vm387_vm1, %v640_v59  ;;  %v4109_v2 = vpop.permute.xlu1 %1161  ;;  %3049 = vmatpush3.xpose.msk.msra.mxu1 %vm387_vm1, %v4104_v1 }
 0x1b9   : > { %3030 = vmatprep.subr.msk.mxu0 %vm387_vm1, %v638_v60 }
 0x1ba   : > { %v903_v3 = vpop.permute.xlu0 %902 }
 0x1bb   : > { %3050 = vmatprep.subr.msk.mxu1 %vm387_vm1, %v903_v3 }
 0x1bc   : > { %3031 = vmatpush3.xpose.msk.msra.mxu0 %vm387_vm1, %v638_v60  ;;  %v4116_v4 = vpop.permute.xlu1 %1159  ;;  %3051 = vmatpush3.xpose.msk.msra.mxu1 %vm387_vm1, %v903_v3 }
 0x1bd   : > { %3072 = vmatprep.subr.msk.mxu0 %vm387_vm1, %v4089_v62 }
 0x1be   : > { %v901_v5 = vpop.permute.xlu0 %900 }
 0x1bf   : > { %3033 = vmatmul.mubr.msk.f32.vlgmr.msra.gmra.mxu0 %vm387_vm1, %v640_v59  ;;  %3052 = vmatprep.subr.msk.mxu1 %vm387_vm1, %v901_v5 }
 0x1c0   : > { %3035 = vmatprep.mubr.msk.f32.mxu0 %vm387_vm1, %v642_v58  ;;  %3073 = vmatpush3.xpose.msk.msra.mxu0 %vm387_vm1, %v4089_v62  ;;  %v4126_v7 = vpop.permute.xlu1 %1157 }
 0x1c1   : > { %3053 = vmatpush3.xpose.msk.msra.mxu1 %vm387_vm1, %v901_v5  ;;  %3074 = vmatprep.subr.msk.mxu0 %vm387_vm1, %v4099_v0 }
 0x1c2   : > { %v899_v8 = vpop.permute.xlu0 %898 }
 0x1c3   : > { %3036 = vmatmul.mubr.msk.f32.gmra.mxu0 %vm387_vm1, %v644_v57  ;;  %3054 = vmatprep.subr.msk.mxu1 %vm387_vm1, %v899_v8 }
 0x1c4   : > { %3038 = vmatprep.mubr.msk.f32.mxu0 %vm387_vm1, %v646_v56  ;;  %3075 = vmatpush3.xpose.msk.msra.mxu0 %vm387_vm1, %v4099_v0  ;;  %v1156_v9 = vpop.permute.xlu1 %1155 }
 0x1c5   : > { %3055 = vmatpush3.xpose.msk.msra.mxu1 %vm387_vm1, %v899_v8  ;;  %3076 = vmatprep.subr.msk.mxu0 %vm387_vm1, %v4109_v2 }
 0x1c6   : > { %v897_v12 = vpop.permute.xlu0 %896 }
 0x1c7   : > { %3039 = vmatmul.mubr.msk.f32.gmra.mxu0 %vm387_vm1, %v648_v54  ;;  %3056 = vmatprep.subr.msk.mxu1 %vm387_vm1, %v897_v12 }
 0x1c8   : > { %3041 = vmatprep.mubr.msk.f32.mxu0 %vm387_vm1, %v650_v55  ;;  %3077 = vmatpush3.xpose.msk.msra.mxu0 %vm387_vm1, %v4109_v2  ;;  %v1154_v13 = vpop.permute.xlu1 %1153 }
 0x1c9   : > { %3057 = vmatpush3.xpose.msk.msra.mxu1 %vm387_vm1, %v897_v12  ;;  %3078 = vmatprep.subr.msk.mxu0 %vm387_vm1, %v4116_v4 }
 0x1ca   : > { %v895_v16 = vpop.permute.xlu0 %894 }
 0x1cb   : > { %3042 = vmatmul.mubr.msk.f32.gmra.mxu0 %vm387_vm1, %v4070_v53  ;;  %3058 = vmatprep.subr.msk.mxu1 %vm387_vm1, %v895_v16 }
 0x1cc   : > { %3060 = vmatprep.mubr.msk.f32.mxu1 %vm387_vm1, %v895_v16  ;;  %3079 = vmatpush3.xpose.msk.msra.mxu0 %vm387_vm1, %v4116_v4  ;;  %v1152_v17 = vpop.permute.xlu1 %1151 }
 0x1cd   : > { %3059 = vmatpush3.xpose.msk.msra.mxu1 %vm387_vm1, %v895_v16  ;;  %3080 = vmatprep.subr.msk.mxu0 %vm387_vm1, %v4126_v7 }
 0x1ce   : > { %3088 = vmatprep.mubr.msk.f32.mxu0 %vm387_vm1, %v1152_v17  ;;  %3100 = vmatprep.subr.msk.mxu1 %vm387_vm1, %v4016_v51  ;;  %v4159_v18 = vpop.permute.xlu0 %1697 }
 0x1d0   : > { %3061 = vmatmul.mubr.msk.f32.vlgmr.msra.gmra.mxu1 %vm387_vm1, %v897_v12  ;;  %3081 = vmatpush3.xpose.msk.msra.mxu0 %vm387_vm1, %v4126_v7  ;;  %v4164_v21 = vpop.permute.xlu1 %1695 }
 0x1d1   : > { %3063 = vmatprep.mubr.msk.f32.mxu1 %vm387_vm1, %v899_v8  ;;  %3101 = vmatpush3.xpose.msk.msra.mxu1 %vm387_vm1, %v4016_v51 }
 0x1d2   : > { %3082 = vmatprep.subr.msk.mxu0 %vm387_vm1, %v1156_v9  ;;  %3102 = vmatprep.subr.msk.mxu1 %vm387_vm1, %v3998_v49  ;;  %v4172_v23 = vpop.permute.xlu0 %1693 }
 0x1d4   : > { %3064 = vmatmul.mubr.msk.f32.gmra.mxu1 %vm387_vm1, %v901_v5  ;;  %3083 = vmatpush3.xpose.msk.msra.mxu0 %vm387_vm1, %v1156_v9  ;;  %v4176_v24 = vpop.permute.xlu1 %1691 }
 0x1d5   : > { %3066 = vmatprep.mubr.msk.f32.mxu1 %vm387_vm1, %v903_v3  ;;  %3103 = vmatpush3.xpose.msk.msra.mxu1 %vm387_vm1, %v3998_v49 }
 0x1d6   : > { %3084 = vmatprep.subr.msk.mxu0 %vm387_vm1, %v1154_v13  ;;  %3104 = vmatprep.subr.msk.mxu1 %vm387_vm1, %v4022_v52  ;;  %v4184_v26 = vpop.permute.xlu0 %1689 }
 0x1d8   : > { %3067 = vmatmul.mubr.msk.f32.gmra.mxu1 %vm387_vm1, %v4104_v1  ;;  %3085 = vmatpush3.xpose.msk.msra.mxu0 %vm387_vm1, %v1154_v13  ;;  %v4189_v27 = vpop.permute.xlu1 %1687 }
 0x1d9   : > { %3069 = vmatprep.mubr.msk.f32.mxu1 %vm387_vm1, %v4094_v63  ;;  %3105 = vmatpush3.xpose.msk.msra.mxu1 %vm387_vm1, %v4022_v52 }
 0x1da   : > { %3086 = vmatprep.subr.msk.mxu0 %vm387_vm1, %v1152_v17  ;;  %3106 = vmatprep.subr.msk.mxu1 %vm387_vm1, %v4008_v50  ;;  %v4198_v28 = vpop.permute.xlu0 %1685 }
 0x1dc   : > { %3070 = vmatmul.mubr.msk.f32.gmra.mxu1 %vm387_vm1, %v4084_v61  ;;  %3087 = vmatpush3.xpose.msk.msra.mxu0 %vm387_vm1, %v1152_v17  ;;  %v1684_v29 = vpop.permute.xlu1 %1683 }
 0x1dd   : > { %3116 = vmatprep.mubr.msk.f32.mxu1 %vm387_vm1, %v3968_v46  ;;  %3107 = vmatpush3.xpose.msk.msra.mxu1 %vm387_vm1, %v4008_v50 }
 0x1de   : > { %3108 = vmatprep.subr.msk.mxu1 %vm387_vm1, %v3978_v47  ;;  %v4209_v30 = vpop.permute.xlu0 %1954  ;;  %3128 = vmatprep.subr.msk.mxu0 %vm387_vm1, %v4159_v18 }
 0x1df   : > { %3089 = vmatmul.mubr.msk.f32.vlgmr.msra.gmra.mxu0 %vm387_vm1, %v1154_v13 }
 0x1e0   : > { %3091 = vmatprep.mubr.msk.f32.mxu0 %vm387_vm1, %v1156_v9  ;;  %3129 = vmatpush3.xpose.msk.msra.mxu0 %vm387_vm1, %v4159_v18  ;;  %v4217_v31 = vpop.permute.xlu1 %2211 }
 0x1e1   : > { %3109 = vmatpush3.xpose.msk.msra.mxu1 %vm387_vm1, %v3978_v47  ;;  %3130 = vmatprep.subr.msk.mxu0 %vm387_vm1, %v4164_v21 }
 0x1e2   : > { %3110 = vmatprep.subr.msk.mxu1 %vm387_vm1, %v3958_v45  ;;  %v4225_v32 = vpop.permute.xlu0 %1952 }
 0x1e3   : > { %3092 = vmatmul.mubr.msk.f32.gmra.mxu0 %vm387_vm1, %v4126_v7 }
 0x1e4   : > { %3094 = vmatprep.mubr.msk.f32.mxu0 %vm387_vm1, %v4116_v4  ;;  %3131 = vmatpush3.xpose.msk.msra.mxu0 %vm387_vm1, %v4164_v21  ;;  %v4241_v34 = vpop.permute.xlu1 %2209 }
 0x1e5   : > { %3111 = vmatpush3.xpose.msk.msra.mxu1 %vm387_vm1, %v3958_v45  ;;  %3132 = vmatprep.subr.msk.mxu0 %vm387_vm1, %v4172_v23 }
 0x1e6   : > { %3112 = vmatprep.subr.msk.mxu1 %vm387_vm1, %v3988_v48  ;;  %v4239_v33 = vpop.permute.xlu0 %1950 }
 0x1e7   : > { %3095 = vmatmul.mubr.msk.f32.gmra.mxu0 %vm387_vm1, %v4109_v2 }
 0x1e8   : > { %3097 = vmatprep.mubr.msk.f32.mxu0 %vm387_vm1, %v4099_v0  ;;  %3133 = vmatpush3.xpose.msk.msra.mxu0 %vm387_vm1, %v4172_v23  ;;  %v4262_v36 = vpop.permute.xlu1 %2207 }
 0x1e9   : > { %3113 = vmatpush3.xpose.msk.msra.mxu1 %vm387_vm1, %v3988_v48  ;;  %3134 = vmatprep.subr.msk.mxu0 %vm387_vm1, %v4176_v24 }
 0x1ea   : > { %3114 = vmatprep.subr.msk.mxu1 %vm387_vm1, %v3968_v46  ;;  %v4255_v35 = vpop.permute.xlu0 %1948 }
 0x1eb   : > { %3098 = vmatmul.mubr.msk.f32.gmra.mxu0 %vm387_vm1, %v4089_v62 }
 0x1ec   : > { %3144 = vmatprep.mubr.msk.f32.mxu0 %vm387_vm1, %v1684_v29  ;;  %3135 = vmatpush3.xpose.msk.msra.mxu0 %vm387_vm1, %v4176_v24  ;;  %v4284_v55 = vpop.permute.xlu1 %2205 }
 0x1ed   : > { %3115 = vmatpush3.xpose.msk.msra.mxu1 %vm387_vm1, %v3968_v46  ;;  %3136 = vmatprep.subr.msk.mxu0 %vm387_vm1, %v4184_v26 }
 0x1ee   : > { %3156 = vmatprep.subr.msk.mxu1 %vm387_vm1, %v4209_v30  ;;  %v4270_v53 = vpop.permute.xlu0 %1946 }
 0x1f0   : > { %3117 = vmatmul.mubr.msk.f32.vlgmr.msra.gmra.mxu1 %vm387_vm1, %v3988_v48  ;;  %3137 = vmatpush3.xpose.msk.msra.mxu0 %vm387_vm1, %v4184_v26  ;;  %v4302_v57 = vpop.permute.xlu1 %2203 }
 0x1f1   : > { %3119 = vmatprep.mubr.msk.f32.mxu1 %vm387_vm1, %v3958_v45  ;;  %3157 = vmatpush3.xpose.msk.msra.mxu1 %vm387_vm1, %v4209_v30 }
 0x1f2   : > { %3138 = vmatprep.subr.msk.mxu0 %vm387_vm1, %v4189_v27  ;;  %3158 = vmatprep.subr.msk.mxu1 %vm387_vm1, %v4225_v32  ;;  %v1945_v54 = vpop.permute.xlu0 %1944 }
 0x1f4   : > { %3120 = vmatmul.mubr.msk.f32.gmra.mxu1 %vm387_vm1, %v3978_v47  ;;  %3139 = vmatpush3.xpose.msk.msra.mxu0 %vm387_vm1, %v4189_v27  ;;  %v4321_v59 = vpop.permute.xlu1 %2201 }
 0x1f5   : > { %3122 = vmatprep.mubr.msk.f32.mxu1 %vm387_vm1, %v4008_v50  ;;  %3159 = vmatpush3.xpose.msk.msra.mxu1 %vm387_vm1, %v4225_v32 }
 0x1f6   : > { %3140 = vmatprep.subr.msk.mxu0 %vm387_vm1, %v4198_v28  ;;  %3160 = vmatprep.subr.msk.mxu1 %vm387_vm1, %v4239_v33  ;;  %v1943_v56 = vpop.permute.xlu0 %1942 }
 0x1f8   : > { %3123 = vmatmul.mubr.msk.f32.gmra.mxu1 %vm387_vm1, %v4022_v52  ;;  %3141 = vmatpush3.xpose.msk.msra.mxu0 %vm387_vm1, %v4198_v28  ;;  %v4340_v60 = vpop.permute.xlu1 %2199 }
 0x1f9   : > { %3125 = vmatprep.mubr.msk.f32.mxu1 %vm387_vm1, %v3998_v49  ;;  %3161 = vmatpush3.xpose.msk.msra.mxu1 %vm387_vm1, %v4239_v33 }
 0x1fa   : > { %3142 = vmatprep.subr.msk.mxu0 %vm387_vm1, %v1684_v29  ;;  %3162 = vmatprep.subr.msk.mxu1 %vm387_vm1, %v4255_v35  ;;  %v1941_v58 = vpop.permute.xlu0 %1940 }
 0x1fc   : > { %3126 = vmatmul.mubr.msk.f32.gmra.mxu1 %vm387_vm1, %v4016_v51  ;;  %3143 = vmatpush3.xpose.msk.msra.mxu0 %vm387_vm1, %v1684_v29  ;;  %v2198_v61 = vpop.permute.xlu1 %2197 }
 0x1fd   : > { %3163 = vmatpush3.xpose.msk.msra.mxu1 %vm387_vm1, %v4255_v35  ;;  %3172 = vmatprep.mubr.msk.f32.mxu1 %vm387_vm1, %v1941_v58 }
 0x1fe   : > { %3164 = vmatprep.subr.msk.mxu1 %vm387_vm1, %v4270_v53  ;;  %3184 = vmatprep.subr.msk.mxu0 %vm387_vm1, %v4217_v31 }
 0x1ff   : > { %3145 = vmatmul.mubr.msk.f32.vlgmr.msra.gmra.mxu0 %vm387_vm1, %v4198_v28 }
 0x200   : > { %3147 = vmatprep.mubr.msk.f32.mxu0 %vm387_vm1, %v4189_v27  ;;  %3185 = vmatpush3.xpose.msk.msra.mxu0 %vm387_vm1, %v4217_v31 }
 0x201   : > { %3165 = vmatpush3.xpose.msk.msra.mxu1 %vm387_vm1, %v4270_v53  ;;  %3186 = vmatprep.subr.msk.mxu0 %vm387_vm1, %v4241_v34 }
 0x202   : > { %3166 = vmatprep.subr.msk.mxu1 %vm387_vm1, %v1945_v54 }
 0x203   : > { %3148 = vmatmul.mubr.msk.f32.gmra.mxu0 %vm387_vm1, %v4184_v26 }
 0x204   : > { %3150 = vmatprep.mubr.msk.f32.mxu0 %vm387_vm1, %v4176_v24  ;;  %3187 = vmatpush3.xpose.msk.msra.mxu0 %vm387_vm1, %v4241_v34 }
 0x205   : > { %3167 = vmatpush3.xpose.msk.msra.mxu1 %vm387_vm1, %v1945_v54  ;;  %3188 = vmatprep.subr.msk.mxu0 %vm387_vm1, %v4262_v36 }
 0x206   : > { %3168 = vmatprep.subr.msk.mxu1 %vm387_vm1, %v1943_v56 }
 0x207   : > { %3151 = vmatmul.mubr.msk.f32.gmra.mxu0 %vm387_vm1, %v4172_v23 }
 0x208   : > { %3153 = vmatprep.mubr.msk.f32.mxu0 %vm387_vm1, %v4164_v21  ;;  %3189 = vmatpush3.xpose.msk.msra.mxu0 %vm387_vm1, %v4262_v36 }
 0x209   : > { %3169 = vmatpush3.xpose.msk.msra.mxu1 %vm387_vm1, %v1943_v56  ;;  %3190 = vmatprep.subr.msk.mxu0 %vm387_vm1, %v4284_v55 }
 0x20a   : > { %3170 = vmatprep.subr.msk.mxu1 %vm387_vm1, %v1941_v58 }
 0x20b   : > { %3154 = vmatmul.mubr.msk.f32.gmra.mxu0 %vm387_vm1, %v4159_v18 }
 0x20c   : > { %v3006_v62 = vpop.f32.mrf.mxu1  ;;  %3191 = vmatpush3.xpose.msk.msra.mxu0 %vm387_vm1, %v4284_v55  ;;  %3200 = vmatprep.mubr.msk.f32.mxu0 %vm387_vm1, %v2198_v61 }
 0x20d   : > { %vm518_vm2 = vcmp.gt.f32.partialorder %v3006_v62, 0.0  ;;  %v526_v63 = vmul.f32 0.2, %v3006_v62  ;;  %3171 = vmatpush3.xpose.msk.msra.mxu1 %vm387_vm1, %v1941_v58  ;;  %3192 = vmatprep.subr.msk.mxu0 %vm387_vm1, %v4302_v57 }
 0x20e   : > { %v478_v0 = vpop.f32.mrf.mxu1 }
 0x20f   : > { %vm517_vm3 = vcmp.gt.f32.partialorder %v478_v0, 0.0  ;;  %v525_v1 = vmul.f32 0.2, %v478_v0  ;;  %v4364_v2 = vsel %vm518_vm2, %v3006_v62, %v526_v63 }
 0x210   : > { %3173 = vmatmul.mubr.msk.f32.vlgmr.msra.gmra.mxu1 %vm387_vm1, %v1943_v56  ;;  %v3009_v3 = vpop.f32.mrf.mxu1  ;;  %3193 = vmatpush3.xpose.msk.msra.mxu0 %vm387_vm1, %v4302_v57  ;;  %v544_v4 = vsel %vm265_vm0, %v4364_v2, -inf }
 0x211   : > { %vm520_vm4 = vcmp.gt.f32.partialorder %v3009_v3, 0.0  ;;  %v528_v5 = vmul.f32 0.2, %v3009_v3  ;;  %3175 = vmatprep.mubr.msk.f32.mxu1 %vm387_vm1, %v1945_v54  ;;  %545 = vmax.xlane.f32.xlu1 %v544_v4  ;;  %v4372_v7 = vsel %vm517_vm3, %v478_v0, %v525_v1 }
 0x212   : > { %3194 = vmatprep.subr.msk.mxu0 %vm387_vm1, %v4321_v59  ;;  %v488_v8 = vpop.f32.mrf.mxu1  ;;  %v541_v9 = vsel %vm265_vm0, %v4372_v7, -inf }
 0x213   : > { %v527_v12 = vmul.f32 0.2, %v488_v8  ;;  %542 = vmax.xlane.f32.xlu0 %v541_v9  ;;  %v4378_v13 = vsel %vm520_vm4, %v3009_v3, %v528_v5  ;;  %vm519_vm5 = vcmp.gt.f32.partialorder %v488_v8, 0.0 }
 0x214   : > { %3176 = vmatmul.mubr.msk.f32.gmra.mxu1 %vm387_vm1, %v4270_v53  ;;  %v3012_v16 = vpop.f32.mrf.mxu1  ;;  %3195 = vmatpush3.xpose.msk.msra.mxu0 %vm387_vm1, %v4321_v59  ;;  %v550_v18 = vsel %vm265_vm0, %v4378_v13, -inf }
 0x215   : > { %3178 = vmatprep.mubr.msk.f32.mxu1 %vm387_vm1, %v4255_v35  ;;  %3196 = vmatprep.subr.msk.mxu0 %vm387_vm1, %v4340_v60  ;;  %v530_v21 = vmul.f32 0.2, %v3012_v16  ;;  %v4390_v24 = vsel %vm519_vm5, %v488_v8, %v527_v12  ;;  %vm522_vm7 = vcmp.gt.f32.partialorder %v3012_v16, 0.0 }
 0x216   : > { %v498_v17 = vpop.f32.mrf.mxu1  ;;  %v547_v35 = vsel %vm265_vm0, %v4390_v24, -inf }
 0x217   : > { %vm521_vm6 = vcmp.gt.f32.partialorder %v498_v17, 0.0  ;;  %v529_v23 = vmul.f32 0.2, %v498_v17  ;;  %551 = vmax.xlane.f32.xlu0 %v550_v18  ;;  %v4405_v54 = vsel %vm522_vm7, %v3012_v16, %v530_v21 }
 0x218   : > { %3179 = vmatmul.mubr.msk.f32.gmra.mxu1 %vm387_vm1, %v4239_v33  ;;  %v3015_v26 = vpop.f32.mrf.mxu1  ;;  %3197 = vmatpush3.xpose.msk.msra.mxu0 %vm387_vm1, %v4340_v60  ;;  %v556_v58 = vsel %vm265_vm0, %v4405_v54, -inf }
 0x219   : > { %3181 = vmatprep.mubr.msk.f32.mxu1 %vm387_vm1, %v4225_v32  ;;  %3198 = vmatprep.subr.msk.mxu0 %vm387_vm1, %v2198_v61  ;;  %v4399_v27 = vsel %vm521_vm6, %v498_v17, %v529_v23  ;;  %v532_v53 = vmul.f32 0.2, %v3015_v26  ;;  %vm524_vm9 = vcmp.gt.f32.partialorder %v3015_v26, 0.0 }
 0x21a   : > { %v508_v28 = vpop.f32.mrf.mxu1  ;;  %v553_v29 = vsel %vm265_vm0, %v4399_v27, -inf }
 0x21b   : > { %vm523_vm8 = vcmp.gt.f32.partialorder %v508_v28, 0.0  ;;  %v531_v33 = vmul.f32 0.2, %v508_v28  ;;  %554 = vmax.xlane.f32.xlu1 %v553_v29  ;;  %548 = vmax.xlane.f32.xlu0 %v547_v35  ;;  %v4416_v62 = vsel %vm524_vm9, %v3015_v26, %v532_v53 }
 0x21c   : > { %3182 = vmatmul.mubr.msk.f32.gmra.mxu1 %vm387_vm1, %v4209_v30  ;;  %3199 = vmatpush3.xpose.msk.msra.mxu0 %vm387_vm1, %v2198_v61  ;;  %v562_v30 = vsel %vm265_vm0, %v4416_v62, -inf }
 0x21d   : > { %v4410_v32 = vsel %vm523_vm8, %v508_v28, %v531_v33 }
 0x21e   : > { %v559_v56 = vsel %vm265_vm0, %v4410_v32, -inf }
 0x21f   : > { %560 = vmax.xlane.f32.xlu1 %v559_v56  ;;  %557 = vmax.xlane.f32.xlu0 %v556_v58 }
 0x220   : > { %3201 = vmatmul.mubr.msk.f32.vlgmr.msra.gmra.mxu0 %vm387_vm1, %v4340_v60 }
 0x221   : > { %3203 = vmatprep.mubr.msk.f32.mxu0 %vm387_vm1, %v4321_v59 }
 0x223   : > { %563 = vmax.xlane.f32.xlu0 %v562_v30 }
 0x224   : > { %3204 = vmatmul.mubr.msk.f32.gmra.mxu0 %vm387_vm1, %v4302_v57 }
 0x225   : > { %3206 = vmatprep.mubr.msk.f32.mxu0 %vm387_vm1, %v4284_v55 }
 0x228   : > { %3207 = vmatmul.mubr.msk.f32.gmra.mxu0 %vm387_vm1, %v4262_v36 }
 0x229   : > { %3209 = vmatprep.mubr.msk.f32.mxu0 %vm387_vm1, %v4241_v34 }
 0x22c   : > { %3210 = vmatmul.mubr.msk.f32.gmra.mxu0 %vm387_vm1, %v4217_v31 }
 0x27f   : > { %v3034_v59 = vpop.f32.mrf.mxu0 }
 0x280   : > { %vm775_vm10 = vcmp.gt.f32.partialorder %v3034_v59, 0.0  ;;  %v783_v60 = vmul.f32 0.2, %v3034_v59 }
 0x281   : > { %v735_v61 = vpop.f32.mrf.mxu0 }
 0x282   : > { %vm774_vm11 = vcmp.gt.f32.partialorder %v735_v61, 0.0  ;;  %v782_v63 = vmul.f32 0.2, %v735_v61  ;;  %v4434_v0 = vsel %vm775_vm10, %v3034_v59, %v783_v60 }
 0x283   : > { %v801_v55 = vsel %vm265_vm0, %v4434_v0, -inf  ;;  %v3037_v36 = vpop.f32.mrf.mxu0 }
 0x284   : > { %802 = vmax.xlane.f32.xlu0 %v801_v55  ;;  %v4438_v57 = vsel %vm774_vm11, %v735_v61, %v782_v63  ;;  %v785_v3 = vmul.f32 0.2, %v3037_v36  ;;  %vm777_vm13 = vcmp.gt.f32.partialorder %v3037_v36, 0.0 }
 0x285   : > { %v798_v34 = vsel %vm265_vm0, %v4438_v57, -inf  ;;  %v745_v31 = vpop.f32.mrf.mxu0 }
 0x286   : > { %799 = vmax.xlane.f32.xlu1 %v798_v34  ;;  %v784_v8 = vmul.f32 0.2, %v745_v31  ;;  %vm776_vm15 = vcmp.gt.f32.partialorder %v745_v31, 0.0  ;;  %v4448_v26 = vsel %vm777_vm13, %v3037_v36, %v785_v3 }
 0x287   : > { %v3040_v16 = vpop.f32.mrf.mxu0  ;;  %v807_v58 = vsel %vm265_vm0, %v4448_v26, -inf }
 0x288   : > { %v4452_v53 = vsel %vm776_vm15, %v745_v31, %v784_v8  ;;  %v787_v30 = vmul.f32 0.2, %v3040_v16  ;;  %vm779_vm4 = vcmp.gt.f32.partialorder %v3040_v16, 0.0 }
 0x289   : > { %v755_v33 = vpop.f32.mrf.mxu0  ;;  %v804_v60 = vsel %vm265_vm0, %v4452_v53, -inf }
 0x28a   : > { %v786_v61 = vmul.f32 0.2, %v755_v33  ;;  %vm778_vm5 = vcmp.gt.f32.partialorder %v755_v33, 0.0 }
 0x28b   : > { %v3043_v55 = vpop.f32.mrf.mxu0 }
 0x28c   : > { %vm781_vm8 = vcmp.gt.f32.partialorder %v3043_v55, 0.0 }
 0x28d   : > { %v765_v8 = vpop.f32.mrf.mxu0 }
 0x28e   : > { %vm780_vm9 = vcmp.gt.f32.partialorder %v765_v8, 0.0 }
 0x290   : > { %v3062_v1 = vpop.f32.mrf.mxu1 }
 0x291   : > { %vm1032_vm12 = vcmp.gt.f32.partialorder %v3062_v1, 0.0  ;;  %v1040_v4 = vmul.f32 0.2, %v3062_v1 }
 0x292   : > { %v992_v5 = vpop.f32.mrf.mxu1 }
 0x293   : > { %vm1031_vm14 = vcmp.gt.f32.partialorder %v992_v5, 0.0  ;;  %v1039_v9 = vmul.f32 0.2, %v992_v5  ;;  %v4442_v12 = vsel %vm1032_vm12, %v3062_v1, %v1040_v4  ;;  %v4464_v1 = vsel %vm779_vm4, %v3040_v16, %v787_v30 }
 0x294   : > { %v3065_v17 = vpop.f32.mrf.mxu1  ;;  %v1058_v18 = vsel %vm265_vm0, %v4442_v12, -inf }
 0x295   : > { %v1042_v21 = vmul.f32 0.2, %v3065_v17  ;;  %1059 = vmax.xlane.f32.xlu0 %v1058_v18  ;;  %v4446_v23 = vsel %vm1031_vm14, %v992_v5, %v1039_v9  ;;  %vm1034_vm2 = vcmp.gt.f32.partialorder %v3065_v17, 0.0  ;;  %v4468_v5 = vsel %vm778_vm5, %v755_v33, %v786_v61 }
 0x296   : > { %v1002_v28 = vpop.f32.mrf.mxu1  ;;  %v1055_v29 = vsel %vm265_vm0, %v4446_v23, -inf  ;;  %v789_v18 = vmul.f32 0.2, %v3043_v55  ;;  %v810_v16 = vsel %vm265_vm0, %v4468_v5, -inf }
 0x297   : > { %v1041_v35 = vmul.f32 0.2, %v1002_v28  ;;  %1056 = vmax.xlane.f32.xlu1 %v1055_v29  ;;  %vm1033_vm3 = vcmp.gt.f32.partialorder %v1002_v28, 0.0  ;;  %v4456_v59 = vsel %vm1034_vm2, %v3065_v17, %v1042_v21  ;;  %v813_v17 = vsel %vm265_vm0, %v4464_v1, -inf }
 0x298   : > { %v3068_v56 = vpop.f32.mrf.mxu1  ;;  %v1064_v36 = vsel %vm265_vm0, %v4456_v59, -inf }
 0x299   : > { %808 = vmax.xlane.f32.xlu0 %v807_v58  ;;  %v4460_v63 = vsel %vm1033_vm3, %v1002_v28, %v1041_v35  ;;  %v1044_v31 = vmul.f32 0.2, %v3068_v56  ;;  %vm1036_vm6 = vcmp.gt.f32.partialorder %v3068_v56, 0.0  ;;  %v788_v28 = vmul.f32 0.2, %v765_v8 }
 0x29a   : > { %v1012_v34 = vpop.f32.mrf.mxu1  ;;  %v1061_v3 = vsel %vm265_vm0, %v4460_v63, -inf }
 0x29b   : > { %805 = vmax.xlane.f32.xlu1 %v804_v60  ;;  %v1043_v4 = vmul.f32 0.2, %v1012_v34  ;;  %vm1035_vm7 = vcmp.gt.f32.partialorder %v1012_v34, 0.0  ;;  %v4472_v21 = vsel %vm1036_vm6, %v3068_v56, %v1044_v31  ;;  %v4480_v60 = vsel %vm781_vm8, %v3043_v55, %v789_v18 }
 0x29c   : > { %v3071_v9 = vpop.f32.mrf.mxu1  ;;  %v1070_v58 = vsel %vm265_vm0, %v4472_v21, -inf  ;;  %v819_v31 = vsel %vm265_vm0, %v4480_v60, -inf }
 0x29d   : > { %1065 = vmax.xlane.f32.xlu0 %v1064_v36  ;;  %v4476_v29 = vsel %vm1035_vm7, %v1012_v34, %v1043_v4  ;;  %v1046_v30 = vmul.f32 0.2, %v3071_v9  ;;  %vm1038_vm10 = vcmp.gt.f32.partialorder %v3071_v9, 0.0  ;;  %v4484_v36 = vsel %vm780_vm9, %v765_v8, %v788_v28 }
 0x29e   : > { %v1022_v35 = vpop.f32.mrf.mxu1  ;;  %v1067_v56 = vsel %vm265_vm0, %v4476_v29, -inf  ;;  %v816_v55 = vsel %vm265_vm0, %v4484_v36, -inf }
 0x29f   : > { %1062 = vmax.xlane.f32.xlu1 %v1061_v3  ;;  %v3090_v33 = vpop.f32.mrf.mxu0  ;;  %v1045_v61 = vmul.f32 0.2, %v1022_v35  ;;  %vm1037_vm11 = vcmp.gt.f32.partialorder %v1022_v35, 0.0  ;;  %v543_v3 = vpop.xlane.xlu0 %542 }
 0x2a0   : > { %v1297_v4 = vmul.f32 0.2, %v3090_v33  ;;  %vm1289_vm12 = vcmp.gt.f32.partialorder %v3090_v33, 0.0 }
 0x2a1   : > { %814 = vmax.xlane.f32.xlu0 %v813_v17  ;;  %v1249_v34 = vpop.f32.mrf.mxu0  ;;  %v4488_v17 = vsel %vm1038_vm10, %v3071_v9, %v1046_v30 }
 0x2a2   : > { %v1296_v18 = vmul.f32 0.2, %v1249_v34  ;;  %vm1288_vm13 = vcmp.gt.f32.partialorder %v1249_v34, 0.0  ;;  %v1076_v28 = vsel %vm265_vm0, %v4488_v17, -inf }
 0x2a3   : > { %811 = vmax.xlane.f32.xlu1 %v810_v16  ;;  %v4492_v16 = vsel %vm1037_vm11, %v1022_v35, %v1045_v61  ;;  %v3093_v8 = vpop.f32.mrf.mxu0  ;;  %v4500_v30 = vpop.xlane.xlu0 %551 }
 0x2a4   : > { %v1073_v9 = vsel %vm265_vm0, %v4492_v16, -inf  ;;  %v1299_v25 = vmul.f32 0.2, %v3093_v8  ;;  %vm1291_vm15 = vcmp.gt.f32.partialorder %v3093_v8, 0.0 }
 0x2a5   : > { %1071 = vmax.xlane.f32.xlu0 %v1070_v58  ;;  %v546_v58 = vpop.xlane.xlu1 %545  ;;  %v1259_v61 = vpop.f32.mrf.mxu0 }
 0x2a6   : > { %v566_v35 = vsub.f32 %v4364_v2, %v546_v58  ;;  %vm1290_vm3 = vcmp.gt.f32.partialorder %v1259_v61, 0.0  ;;  %v4517_v20 = vsel %vm1291_vm15, %v3093_v8, %v1299_v25 }
 0x2a7   : > { %1068 = vmax.xlane.f32.xlu1 %v1067_v56  ;;  %v4496_v56 = vsel %vm1289_vm12, %v3090_v33, %v1297_v4  ;;  %v565_v33 = vsub.f32 %v4372_v7, %v543_v3  ;;  %v3096_v49 = vpop.f32.mrf.mxu0  ;;  %v549_v51 = vpop.xlane.xlu0 %548 }
 0x2a8   : > { %v1315_v22 = vsel %vm265_vm0, %v4496_v56, -inf  ;;  %v575_v58 = vmul.f32 1.442695, %v566_v35  ;;  %vm1293_vm6 = vcmp.gt.f32.partialorder %v3096_v49, 0.0 }
 0x2a9   : > { %820 = vmax.xlane.f32.xlu0 %v819_v31  ;;  %v4502_v31 = vsel %vm1288_vm13, %v1249_v34, %v1296_v18  ;;  %v1298_v34 = vmul.f32 0.2, %v1259_v61  ;;  %v573_v50 = vmul.f32 1.442695, %v565_v33  ;;  %v1269_v14 = vpop.f32.mrf.mxu0 }
 0x2aa   : > { %3284 = vpow2.f32 %v575_v58  ;;  %vm1292_vm7 = vcmp.gt.f32.partialorder %v1269_v14, 0.0 }
 0x2ab   : > { %817 = vmax.xlane.f32.xlu1 %v816_v55  ;;  %3286 = vpow2.f32 %v573_v50  ;;  %v558_v33 = vpop.xlane.xlu0 %557  ;;  %v3099_v15 = vpop.f32.mrf.mxu0 }
 0x2ac   : > { %vm1295_vm10 = vcmp.gt.f32.partialorder %v3099_v15, 0.0 }
 0x2ad   : > { %1077 = vmax.xlane.f32.xlu0 %v1076_v28 }
 0x2af   : > { %1074 = vmax.xlane.f32.xlu1 %v1073_v9  ;;  %v1312_v9 = vsel %vm265_vm0, %v4502_v31, -inf }
 0x2b0   : > { %v3118_v55 = vpop.f32.mrf.mxu1 }
 0x2b1   : > { %vm1564_vm14 = vcmp.gt.f32.partialorder %v3118_v55, 0.0  ;;  %v1572_v28 = vmul.f32 0.2, %v3118_v55  ;;  %1316 = vmax.xlane.f32.xlu0 %v1315_v22 }
 0x2b2   : > { %v1524_v4 = vpop.f32.mrf.mxu1 }
 0x2b3   : > { %vm1563_vm2 = vcmp.gt.f32.partialorder %v1524_v4, 0.0  ;;  %v1571_v18 = vmul.f32 0.2, %v1524_v4  ;;  %1313 = vmax.xlane.f32.xlu1 %v1312_v9  ;;  %v4510_v2 = vsel %vm1564_vm14, %v3118_v55, %v1572_v28  ;;  %v4521_v28 = vsel %vm1290_vm3, %v1259_v61, %v1298_v34 }
 0x2b4   : > { %v3121_v19 = vpop.f32.mrf.mxu1  ;;  %v1590_v22 = vsel %vm265_vm0, %v4510_v2, -inf  ;;  %v1318_v8 = vsel %vm265_vm0, %v4521_v28, -inf  ;;  %v568_v34 = vsub.f32 %v4378_v13, %v4500_v30  ;;  %v570_v30 = vsub.f32 %v4405_v54, %v558_v33 }
 0x2b5   : > { %v1574_v7 = vmul.f32 0.2, %v3121_v19  ;;  %1591 = vmax.xlane.f32.xlu0 %v1590_v22  ;;  %v4514_v3 = vsel %vm1563_vm2, %v1524_v4, %v1571_v18  ;;  %vm1566_vm4 = vcmp.gt.f32.partialorder %v3121_v19, 0.0  ;;  %v1321_v4 = vsel %vm265_vm0, %v4517_v20, -inf }
 0x2b6   : > { %v1534_v9 = vpop.f32.mrf.mxu1  ;;  %v1587_v35 = vsel %vm265_vm0, %v4514_v3, -inf  ;;  %v1301_v18 = vmul.f32 0.2, %v3096_v49  ;;  %v1300_v22 = vmul.f32 0.2, %v1269_v14 }
 0x2b7   : > { %v1573_v55 = vmul.f32 0.2, %v1534_v9  ;;  %1588 = vmax.xlane.f32.xlu1 %v1587_v35  ;;  %vm1565_vm5 = vcmp.gt.f32.partialorder %v1534_v9, 0.0  ;;  %v4525_v25 = vsel %vm1566_vm4, %v3121_v19, %v1574_v7  ;;  %v555_v19 = vpop.xlane.xlu1 %554  ;;  %v579_v13 = vmul.f32 1.442695, %v568_v34  ;;  %v1279_v34 = vpop.f32.mrf.mxu0 }
 0x2b8   : > { %v3124_v52 = vpop.f32.mrf.mxu1  ;;  %v1596_v35 = vsel %vm265_vm0, %v4525_v25, -inf  ;;  %v4535_v50 = vsel %vm1293_vm6, %v3096_v49, %v1301_v18  ;;  %v569_v49 = vsub.f32 %v4399_v27, %v555_v19  ;;  %v564_v18 = vpop.xlane.xlu0 %563  ;;  %v583_v54 = vmul.f32 1.442695, %v570_v30 }
 0x2b9   : > { %1322 = vmax.xlane.f32.xlu0 %v1321_v4  ;;  %v4529_v61 = vsel %vm1565_vm5, %v1534_v9, %v1573_v55  ;;  %v1576_v7 = vmul.f32 0.2, %v3124_v52  ;;  %v567_v4 = vsub.f32 %v4390_v24, %v549_v51  ;;  %vm1568_vm8 = vcmp.gt.f32.partialorder %v3124_v52, 0.0  ;;  %v3285_v19 = vpop.eup %3284 }
 0x2ba   : > { %v1544_v58 = vpop.f32.mrf.mxu1  ;;  %v1593_v9 = vsel %vm265_vm0, %v4529_v61, -inf  ;;  %3288 = vpow2.f32 %v579_v13  ;;  %v572_v33 = vsub.f32 %v4416_v62, %v564_v18  ;;  %v1302_v13 = vmul.f32 0.2, %v1279_v34 }
 0x2bb   : > { %1319 = vmax.xlane.f32.xlu1 %v1318_v8  ;;  %v1575_v55 = vmul.f32 0.2, %v1544_v58  ;;  %v4540_v8 = vsel %vm1292_vm7, %v1269_v14, %v1300_v22  ;;  %vm1567_vm9 = vcmp.gt.f32.partialorder %v1544_v58, 0.0  ;;  %v4546_v51 = vsel %vm1568_vm8, %v3124_v52, %v1576_v7  ;;  %v561_v14 = vpop.xlane.xlu1 %560 }
 0x2bc   : > { %v577_v24 = vmul.f32 1.442695, %v567_v4  ;;  %v3127_v45 = vpop.f32.mrf.mxu1  ;;  %v1602_v27 = vsel %vm265_vm0, %v4546_v51, -inf  ;;  %v581_v52 = vmul.f32 1.442695, %v569_v49  ;;  %v571_v4 = vsub.f32 %v4410_v32, %v561_v14 }
 0x2bd   : > { %1597 = vmax.xlane.f32.xlu0 %v1596_v35  ;;  %v1327_v35 = vsel %vm265_vm0, %v4535_v50, -inf  ;;  %v4550_v22 = vsel %vm1567_vm9, %v1544_v58, %v1575_v55  ;;  %v1303_v7 = vmul.f32 0.2, %v3099_v15  ;;  %v3287_v55 = vpop.eup %3286  ;;  %v587_v62 = vmul.f32 1.442695, %v572_v33 }
 0x2be   : > { %3290 = vpow2.f32 %v577_v24  ;;  %v1599_v58 = vsel %vm265_vm0, %v4550_v22, -inf  ;;  %vm1294_vm11 = vcmp.gt.f32.partialorder %v1279_v34, 0.0  ;;  %v1554_v30 = vpop.f32.mrf.mxu1  ;;  %v1578_v18 = vmul.f32 0.2, %v3127_v45 }
 0x2bf   : > { %1594 = vmax.xlane.f32.xlu1 %v1593_v9  ;;  %v1324_v9 = vsel %vm265_vm0, %v4540_v8, -inf  ;;  %3292 = vpow2.f32 %v583_v54  ;;  %v4559_v49 = vsel %vm1295_vm10, %v3099_v15, %v1303_v7  ;;  %v585_v24 = vmul.f32 1.442695, %v571_v4  ;;  %v3146_v32 = vpop.f32.mrf.mxu0 }
 0x2c0   : > { %3294 = vpow2.f32 %v581_v52  ;;  %vm1570_vm12 = vcmp.gt.f32.partialorder %v3127_v45, 0.0  ;;  %v1577_v14 = vmul.f32 0.2, %v1554_v30  ;;  %vm1569_vm13 = vcmp.gt.f32.partialorder %v1554_v30, 0.0 }
 0x2c1   : > { %1328 = vmax.xlane.f32.xlu0 %v1327_v35  ;;  %v592_v35 = vsel %vm265_vm0, %v3285_v19, 0.0  ;;  %3296 = vpow2.f32 %v587_v62  ;;  %v1333_v54 = vsel %vm265_vm0, %v4559_v49, -inf  ;;  %v4566_v33 = vsel %vm1570_vm12, %v3127_v45, %v1578_v18  ;;  %v1781_v15 = vpop.f32.mrf.mxu0 }
 0x2c2   : > { %3298 = vpow2.f32 %v585_v24  ;;  %v4570_v52 = vsel %vm1569_vm13, %v1554_v30, %v1577_v14  ;;  %v1829_v14 = vmul.f32 0.2, %v3146_v32  ;;  %vm1821_vm14 = vcmp.gt.f32.partialorder %v3146_v32, 0.0 }
 0x2c3   : > { %1325 = vmax.xlane.f32.xlu1 %v1324_v9  ;;  %v589_v9 = vsel %vm265_vm0, %v3287_v55, 0.0  ;;  %v3149_v4 = vpop.f32.mrf.mxu0  ;;  %vm1820_vm15 = vcmp.gt.f32.partialorder %v1781_v15, 0.0 }
 0x2c4   : > { %v1831_v11 = vmul.f32 0.2, %v3149_v4  ;;  %vm1823_vm4 = vcmp.gt.f32.partialorder %v3149_v4, 0.0 }
 0x2c5   : > { %1603 = vmax.xlane.f32.xlu0 %v1602_v27  ;;  %v4562_v27 = vsel %vm1294_vm11, %v1279_v34, %v1302_v13  ;;  %v1608_v34 = vsel %vm265_vm0, %v4566_v33, -inf  ;;  %v1791_v62 = vpop.f32.mrf.mxu0 }
 0x2c6   : > { %v1330_v19 = vsel %vm265_vm0, %v4562_v27, -inf  ;;  %vm1822_vm5 = vcmp.gt.f32.partialorder %v1791_v62, 0.0  ;;  %v4596_v46 = vsel %vm1823_vm4, %v3149_v4, %v1831_v11 }
 0x2c7   : > { %1600 = vmax.xlane.f32.xlu1 %v1599_v58  ;;  %v3289_v7 = vpop.eup %3288  ;;  %v1605_v58 = vsel %vm265_vm0, %v4570_v52, -inf }
 0x2c8   : > { %v598_v45 = vsel %vm265_vm0, %v3289_v7, 0.0 }
 0x2c9   : > { %593 = vadd.xlane.f32.xlu0 %v592_v35 }
 0x2cb   : > { %590 = vadd.xlane.f32.xlu1 %v589_v9  ;;  %v3291_v55 = vpop.eup %3290 }
 0x2cc   : > { %v3293_v13 = vpop.eup %3292  ;;  %v595_v35 = vsel %vm265_vm0, %v3291_v55, 0.0 }
 0x2cd   : > { %1334 = vmax.xlane.f32.xlu0 %v1333_v54  ;;  %v3295_v30 = vpop.eup %3294  ;;  %v604_v24 = vsel %vm265_vm0, %v3293_v13, 0.0  ;;  %v3152_v54 = vpop.f32.mrf.mxu0 }
 0x2ce   : > { %v3297_v9 = vpop.eup %3296  ;;  %v1833_v41 = vmul.f32 0.2, %v3152_v54  ;;  %vm1825_vm8 = vcmp.gt.f32.partialorder %v3152_v54, 0.0 }
 0x2cf   : > { %1331 = vmax.xlane.f32.xlu1 %v1330_v19  ;;  %v601_v19 = vsel %vm265_vm0, %v3295_v30, 0.0  ;;  %v1801_v10 = vpop.f32.mrf.mxu0 }
 0x2d0   : > { %v3174_v18 = vpop.f32.mrf.mxu1  ;;  %vm1824_vm9 = vcmp.gt.f32.partialorder %v1801_v10, 0.0  ;;  %v4614_v44 = vsel %vm1825_vm8, %v3152_v54, %v1833_v41 }
 0x2d1   : > { %1609 = vmax.xlane.f32.xlu0 %v1608_v34  ;;  %v3299_v34 = vpop.eup %3298  ;;  %v2086_v55 = vmul.f32 0.2, %v3174_v18  ;;  %vm2078_vm2 = vcmp.gt.f32.partialorder %v3174_v18, 0.0 }
 0x2d2   : > { %v2038_v7 = vpop.f32.mrf.mxu1  ;;  %v607_v13 = vsel %vm265_vm0, %v3299_v34, 0.0 }
 0x2d3   : > { %1606 = vmax.xlane.f32.xlu1 %v1605_v58  ;;  %v1828_v58 = vmul.f32 0.2, %v1781_v15  ;;  %vm2077_vm3 = vcmp.gt.f32.partialorder %v2038_v7, 0.0 }
 0x2d4   : > { %v3177_v30 = vpop.f32.mrf.mxu1 }
 0x2d5   : > { %599 = vadd.xlane.f32.xlu0 %v598_v45  ;;  %v610_v45 = vsel %vm265_vm0, %v3297_v9, 0.0  ;;  %v4584_v47 = vsel %vm1820_vm15, %v1781_v15, %v1828_v58  ;;  %v4588_v9 = vsel %vm2078_vm2, %v3174_v18, %v2086_v55  ;;  %vm2080_vm6 = vcmp.gt.f32.partialorder %v3177_v30, 0.0 }
 0x2d6   : > { %v2048_v15 = vpop.f32.mrf.mxu1  ;;  %v2104_v58 = vsel %vm265_vm0, %v4588_v9, -inf }
 0x2d7   : > { %596 = vadd.xlane.f32.xlu1 %v595_v35  ;;  %v4581_v35 = vsel %vm1821_vm14, %v3146_v32, %v1829_v14  ;;  %v3155_v32 = vpop.f32.mrf.mxu0  ;;  %v1844_v14 = vsel %vm265_vm0, %v4584_v47, -inf  ;;  %vm2079_vm7 = vcmp.gt.f32.partialorder %v2048_v15, 0.0 }
 0x2d8   : > { %v1835_v37 = vmul.f32 0.2, %v3155_v32  ;;  %vm1827_vm12 = vcmp.gt.f32.partialorder %v3155_v32, 0.0 }
 0x2d9   : > { %605 = vadd.xlane.f32.xlu0 %v604_v24  ;;  %v2085_v24 = vmul.f32 0.2, %v2038_v7  ;;  %v1811_v18 = vpop.f32.mrf.mxu0 }
 0x2da   : > { %vm1826_vm13 = vcmp.gt.f32.partialorder %v1811_v18, 0.0  ;;  %v4630_v40 = vsel %vm1827_vm12, %v3155_v32, %v1835_v37 }
 0x2db   : > { %602 = vadd.xlane.f32.xlu1 %v601_v19  ;;  %v1847_v19 = vsel %vm265_vm0, %v4581_v35, -inf  ;;  %v4592_v34 = vsel %vm2077_vm3, %v2038_v7, %v2085_v24  ;;  %v3180_v7 = vpop.f32.mrf.mxu1 }
 0x2dc   : > { %v2101_v55 = vsel %vm265_vm0, %v4592_v34, -inf  ;;  %v2090_v42 = vmul.f32 0.2, %v3180_v7  ;;  %vm2082_vm10 = vcmp.gt.f32.partialorder %v3180_v7, 0.0 }
 0x2dd   : > { %611 = vadd.xlane.f32.xlu0 %v610_v45  ;;  %v1830_v45 = vmul.f32 0.2, %v1791_v62 }
 0x2de   : > { %v4622_v39 = vsel %vm2082_vm10, %v3180_v7, %v2090_v42  ;;  %vm1416_vm10 = vcmask 261120  }
 0x2df   : > { %608 = vadd.xlane.f32.xlu1 %v607_v13  ;;  %v2088_v13 = vmul.f32 0.2, %v3177_v30  ;;  %v4600_v48 = vsel %vm1822_vm5, %v1791_v62, %v1830_v45  ;;  %v2058_v62 = vpop.f32.mrf.mxu1 }
 0x2e0   : > { %v4602_v24 = vpop.f32.mrf.mxu0  ;;  %v1850_v4 = vsel %vm265_vm0, %v4600_v48, -inf  ;;  %vm2081_vm11 = vcmp.gt.f32.partialorder %v2058_v62, 0.0 }
 0x2e1   : > { %1848 = vmax.xlane.f32.xlu0 %v1847_v19  ;;  %v2087_v19 = vmul.f32 0.2, %v2048_v15  ;;  %v4606_v11 = vsel %vm2080_vm6, %v3177_v30, %v2088_v13  ;;  %v2089_v13 = vmul.f32 0.2, %v2058_v62  ;;  %vm2335_vm2 = vcmp.gt.f32.partialorder %v4602_v24, 0.0 }
 0x2e2   : > { %v2295_v45 = vpop.f32.mrf.mxu0  ;;  %v2110_v43 = vsel %vm265_vm0, %v4606_v11, -inf }
 0x2e3   : > { %1845 = vmax.xlane.f32.xlu1 %v1844_v14  ;;  %v1853_v14 = vsel %vm265_vm0, %v4596_v46, -inf  ;;  %v4626_v54 = vsel %vm2081_vm11, %v2058_v62, %v2089_v13  ;;  %v1865_v13 = vsel %vm265_vm0, %v4630_v40, -inf  ;;  %vm2334_vm3 = vcmp.gt.f32.partialorder %v2295_v45, 0.0 }
 0x2e4   : > { %v2113_v42 = vsel %vm265_vm0, %v4626_v54, -inf  ;;  %vm1425_vm11 = vcmask 392192  }
 0x2e5   : > { %2105 = vmax.xlane.f32.xlu0 %v2104_v58  ;;  %v1832_v58 = vmul.f32 0.2, %v1801_v10 }
 0x2e7   : > { %2102 = vmax.xlane.f32.xlu1 %v2101_v55  ;;  %v4610_v55 = vsel %vm2079_vm7, %v2048_v15, %v2087_v19  ;;  %v3183_v15 = vpop.f32.mrf.mxu1  ;;  %v3205_v19 = vpop.f32.mrf.mxu0 }
 0x2e8   : > { %v2107_v30 = vsel %vm265_vm0, %v4610_v55, -inf  ;;  %v2092_v38 = vmul.f32 0.2, %v3183_v15  ;;  %vm2084_vm14 = vcmp.gt.f32.partialorder %v3183_v15, 0.0  ;;  %vm2337_vm4 = vcmp.gt.f32.partialorder %v3205_v19, 0.0 }
 0x2e9   : > { %1854 = vmax.xlane.f32.xlu0 %v1853_v14  ;;  %v4618_v14 = vsel %vm1824_vm9, %v1801_v10, %v1832_v58  ;;  %v2068_v10 = vpop.f32.mrf.mxu1  ;;  %v2305_v58 = vpop.f32.mrf.mxu0 }
 0x2ea   : > { %v1856_v41 = vsel %vm265_vm0, %v4618_v14, -inf  ;;  %v2091_v7 = vmul.f32 0.2, %v2068_v10  ;;  %vm2083_vm15 = vcmp.gt.f32.partialorder %v2068_v10, 0.0  ;;  %v4639_v6 = vsel %vm2084_vm14, %v3183_v15, %v2092_v38 }
 0x2eb   : > { %1851 = vmax.xlane.f32.xlu1 %v1850_v4  ;;  %v1859_v4 = vsel %vm265_vm0, %v4614_v44, -inf  ;;  %v3208_v62 = vpop.f32.mrf.mxu0  ;;  %5271 = vst [vmem:[#allocation38_spill] sm:$0xff] %v4639_v6  ;;  %v2344_v15 = vmul.f32 0.2, %v2305_v58  ;;  %vm2336_vm5 = vcmp.gt.f32.partialorder %v2305_v58, 0.0 }
 0x2ec   : > { %v4644_v32 = vsel %vm2083_vm15, %v2068_v10, %v2091_v7  ;;  %vm2339_vm6 = vcmp.gt.f32.partialorder %v3208_v62, 0.0 }
 0x2ed   : > { %2111 = vmax.xlane.f32.xlu0 %v2110_v43  ;;  %v1834_v43 = vmul.f32 0.2, %v1811_v18  ;;  %v2119_v38 = vsel %vm265_vm0, %v4644_v32, -inf }
 0x2ef   : > { %2108 = vmax.xlane.f32.xlu1 %v2107_v30  ;;  %v2116_v30 = vsel %vm265_vm0, %v4622_v39, -inf }
 0x2f1   : > { %1860 = vmax.xlane.f32.xlu0 %v1859_v4  ;;  %v4634_v4 = vsel %vm1826_vm13, %v1811_v18, %v1834_v43  ;;  %v2315_v18 = vpop.f32.mrf.mxu0  ;;  %v2122_v43 = vsel %vm265_vm0, %v4639_v6, -inf }
 0x2f2   : > { %5270 = vst [vmem:[#allocation37_spill] sm:$0xff] %v4634_v4  ;;  %v1862_v37 = vsel %vm265_vm0, %v4634_v4, -inf  ;;  %v2347_v4 = vmul.f32 0.2, %v3208_v62  ;;  %vm2338_vm7 = vcmp.gt.f32.partialorder %v2315_v18, 0.0 }
 0x2f3   : > { %1857 = vmax.xlane.f32.xlu1 %v1856_v41  ;;  %v2343_v41 = vmul.f32 0.2, %v4602_v24  ;;  %v3211_v7 = vpop.f32.mrf.mxu0 }
 0x2f4   : > { %vm2341_vm8 = vcmp.gt.f32.partialorder %v3211_v7, 0.0 }
 0x2f5   : > { %2117 = vmax.xlane.f32.xlu0 %v2116_v30  ;;  %v2342_v30 = vmul.f32 0.2, %v2295_v45 }
 0x2f7   : > { %2114 = vmax.xlane.f32.xlu1 %v2113_v42  ;;  %v2345_v42 = vmul.f32 0.2, %v3205_v19  ;;  %v4653_v10 = vsel %vm2334_vm3, %v2295_v45, %v2342_v30  ;;  %v2325_v45 = vpop.f32.mrf.mxu0 }
 0x2f8   : > { %vm2340_vm9 = vcmp.gt.f32.partialorder %v2325_v45, 0.0 }
 0x2f9   : > { %1866 = vmax.xlane.f32.xlu0 %v1865_v13  ;;  %v4649_v13 = vsel %vm2335_vm2, %v4602_v24, %v2343_v41  ;;  %v4657_v6 = vsel %vm2337_vm4, %v3205_v19, %v2345_v42  ;;  %v2358_v24 = vsel %vm265_vm0, %v4653_v10, -inf  ;;  %v2346_v41 = vmul.f32 0.2, %v2315_v18 }
 0x2fa   : > { %5272 = vst [vmem:[#allocation39_spill] sm:$0xff] %v4649_v13  ;;  %v2367_v30 = vsel %vm265_vm0, %v4657_v6, -inf  ;;  %v2348_v42 = vmul.f32 0.2, %v2325_v45 }
 0x2fb   : > { %1863 = vmax.xlane.f32.xlu1 %v1862_v37  ;;  %v2361_v37 = vsel %vm265_vm0, %v4649_v13, -inf  ;;  %v4665_v13 = vsel %vm2339_vm6, %v3208_v62, %v2347_v4 }
 0x2fc   : > { %v4677_v4 = vsel %vm2340_vm9, %v2325_v45, %v2348_v42 }
 0x2fd   : > { %2123 = vmax.xlane.f32.xlu0 %v2122_v43  ;;  %v4661_v43 = vsel %vm2336_vm5, %v2305_v58, %v2344_v15  ;;  %v2373_v58 = vsel %vm265_vm0, %v4665_v13, -inf }
 0x2fe   : > { %v2364_v19 = vsel %vm265_vm0, %v4661_v43, -inf }
 0x2ff   : > { %2120 = vmax.xlane.f32.xlu1 %v2119_v38  ;;  %v2349_v38 = vmul.f32 0.2, %v3211_v7 }
 0x301   : > { %2362 = vmax.xlane.f32.xlu0 %v2361_v37  ;;  %v4669_v37 = vsel %vm2338_vm7, %v2315_v18, %v2346_v41  ;;  %v4673_v15 = vsel %vm2341_vm8, %v3211_v7, %v2349_v38  ;;  %v2376_v41 = vsel %vm265_vm0, %v4677_v4, -inf }
 0x302   : > { %5273 = vst [vmem:[#allocation40_spill] sm:$0xff] %v4669_v37  ;;  %5274 = vst [vmem:[#allocation41_spill] sm:$0xff] %v4673_v15  ;;  %v2379_v62 = vsel %vm265_vm0, %v4673_v15, -inf }
 0x303   : > { %2359 = vmax.xlane.f32.xlu1 %v2358_v24  ;;  %v2370_v24 = vsel %vm265_vm0, %v4669_v37, -inf }
 0x305   : > { %2368 = vmax.xlane.f32.xlu0 %v2367_v30 }
 0x307   : > { %2365 = vmax.xlane.f32.xlu1 %v2364_v19 }
 0x309   : > { %2374 = vmax.xlane.f32.xlu0 %v2373_v58 }
 0x30b   : > { %2371 = vmax.xlane.f32.xlu1 %v2370_v24 }
 0x30d   : > { %2380 = vmax.xlane.f32.xlu0 %v2379_v62  ;;  %v803_v30 = vpop.xlane.xlu0 %802 }
 0x30e   : > { %v823_v18 = vsub.f32 %v4434_v0, %v803_v30 }
 0x30f   : > { %2377 = vmax.xlane.f32.xlu1 %v2376_v41  ;;  %v800_v19 = vpop.xlane.xlu1 %799 }
 0x310   : > { %v832_v7 = vmul.f32 1.442695, %v823_v18  ;;  %v822_v38 = vsub.f32 %v4438_v57, %v800_v19 }
 0x312   : > { %3300 = vpow2.f32 %v832_v7  ;;  %v830_v58 = vmul.f32 1.442695, %v822_v38 }
 0x314   : > { %3302 = vpow2.f32 %v830_v58 }
 0x31e   : > { %v1060_v45 = vpop.xlane.xlu0 %1059 }
 0x31f   : > { %v3301_v42 = vpop.eup %3300  ;;  %v1080_v24 = vsub.f32 %v4442_v12, %v1060_v45 }
 0x320   : > { %v1057_v15 = vpop.xlane.xlu1 %1056  ;;  %v849_v62 = vsel %vm265_vm0, %v3301_v42, 0.0 }
 0x321   : > { %v3303_v37 = vpop.eup %3302  ;;  %v1089_v0 = vmul.f32 1.442695, %v1080_v24  ;;  %v1079_v30 = vsub.f32 %v4446_v23, %v1057_v15  ;;  %850 = vadd.xlane.f32.xlu0 %v849_v62 }
 0x322   : > { %v809_v41 = vpop.xlane.xlu0 %808  ;;  %v846_v18 = vsel %vm265_vm0, %v3303_v37, 0.0 }
 0x323   : > { %3304 = vpow2.f32 %v1089_v0  ;;  %v1087_v57 = vmul.f32 1.442695, %v1079_v30  ;;  %v825_v19 = vsub.f32 %v4448_v26, %v809_v41  ;;  %847 = vadd.xlane.f32.xlu1 %v846_v18 }
 0x324   : > { %v806_v7 = vpop.xlane.xlu1 %805 }
 0x325   : > { %3306 = vpow2.f32 %v1087_v57  ;;  %v836_v38 = vmul.f32 1.442695, %v825_v19  ;;  %v824_v12 = vsub.f32 %v4452_v53, %v806_v7 }
 0x326   : > { %v1066_v58 = vpop.xlane.xlu0 %1065 }
 0x327   : > { %3308 = vpow2.f32 %v836_v38  ;;  %v834_v45 = vmul.f32 1.442695, %v824_v12  ;;  %v1082_v42 = vsub.f32 %v4456_v59, %v1066_v58 }
 0x328   : > { %v1063_v23 = vpop.xlane.xlu1 %1062 }
 0x329   : > { %3310 = vpow2.f32 %v834_v45  ;;  %v1093_v15 = vmul.f32 1.442695, %v1082_v42  ;;  %v1081_v37 = vsub.f32 %v4460_v63, %v1063_v23 }
 0x32a   : > { %v815_v24 = vpop.xlane.xlu0 %814 }
 0x32b   : > { %3312 = vpow2.f32 %v1093_v15  ;;  %v1091_v62 = vmul.f32 1.442695, %v1081_v37  ;;  %v827_v26 = vsub.f32 %v4464_v1, %v815_v24 }
 0x32c   : > { %v812_v0 = vpop.xlane.xlu1 %811 }
 0x32d   : > { %3314 = vpow2.f32 %v1091_v62  ;;  %v840_v30 = vmul.f32 1.442695, %v827_v26  ;;  %v826_v53 = vsub.f32 %v4468_v5, %v812_v0 }
 0x32e   : > { %v1072_v41 = vpop.xlane.xlu0 %1071 }
 0x32f   : > { %3316 = vpow2.f32 %v840_v30  ;;  %v838_v18 = vmul.f32 1.442695, %v826_v53  ;;  %v1084_v59 = vsub.f32 %v4472_v21, %v1072_v41 }
 0x330   : > { %v3305_v57 = vpop.eup %3304  ;;  %v1069_v19 = vpop.xlane.xlu1 %1068 }
 0x331   : > { %3318 = vpow2.f32 %v838_v18  ;;  %v1097_v7 = vmul.f32 1.442695, %v1084_v59  ;;  %v1083_v63 = vsub.f32 %v4476_v29, %v1069_v19  ;;  %v1106_v38 = vsel %vm265_vm0, %v3305_v57, 0.0 }
 0x332   : > { %v3307_v12 = vpop.eup %3306  ;;  %v821_v1 = vpop.xlane.xlu0 %820  ;;  %1107 = vadd.xlane.f32.xlu0 %v1106_v38 }
 0x333   : > { %3320 = vpow2.f32 %v1097_v7  ;;  %v1095_v58 = vmul.f32 1.442695, %v1083_v63  ;;  %v829_v5 = vsub.f32 %v4480_v60, %v821_v1  ;;  %v1103_v45 = vsel %vm265_vm0, %v3307_v12, 0.0 }
 0x334   : > { %v3309_v42 = vpop.eup %3308  ;;  %1104 = vadd.xlane.f32.xlu1 %v1103_v45  ;;  %v818_v21 = vpop.xlane.xlu1 %817 }
 0x335   : > { %3322 = vpow2.f32 %v1095_v58  ;;  %v844_v23 = vmul.f32 1.442695, %v829_v5  ;;  %v828_v15 = vsub.f32 %v4484_v36, %v818_v21  ;;  %v855_v29 = vsel %vm265_vm0, %v3309_v42, 0.0 }
 0x336   : > { %v3311_v37 = vpop.eup %3310  ;;  %v1078_v24 = vpop.xlane.xlu0 %1077  ;;  %856 = vadd.xlane.f32.xlu0 %v855_v29 }
 0x337   : > { %3324 = vpow2.f32 %v844_v23  ;;  %v842_v62 = vmul.f32 1.442695, %v828_v15  ;;  %v1086_v26 = vsub.f32 %v4488_v17, %v1078_v24  ;;  %v852_v60 = vsel %vm265_vm0, %v3311_v37, 0.0 }
 0x338   : > { %v3313_v0 = vpop.eup %3312  ;;  %853 = vadd.xlane.f32.xlu1 %v852_v60  ;;  %v1075_v30 = vpop.xlane.xlu1 %1074 }
 0x339   : > { %3326 = vpow2.f32 %v842_v62  ;;  %v1101_v53 = vmul.f32 1.442695, %v1086_v26  ;;  %v1085_v41 = vsub.f32 %v4492_v16, %v1075_v30  ;;  %v1112_v36 = vsel %vm265_vm0, %v3313_v0, 0.0 }
 0x33a   : > { %v3315_v18 = vpop.eup %3314  ;;  %v1317_v59 = vpop.xlane.xlu0 %1316  ;;  %1113 = vadd.xlane.f32.xlu0 %v1112_v36 }
 0x33b   : > { %3328 = vpow2.f32 %v1101_v53  ;;  %v1099_v57 = vmul.f32 1.442695, %v1085_v41  ;;  %v1337_v19 = vsub.f32 %v4496_v56, %v1317_v59  ;;  %v1109_v17 = vsel %vm265_vm0, %v3315_v18, 0.0 }
 0x33c   : > { %v3317_v7 = vpop.eup %3316  ;;  %1110 = vadd.xlane.f32.xlu1 %v1109_v17  ;;  %v1314_v63 = vpop.xlane.xlu1 %1313 }
 0x33d   : > { %3330 = vpow2.f32 %v1099_v57  ;;  %v1346_v38 = vmul.f32 1.442695, %v1337_v19  ;;  %v1336_v12 = vsub.f32 %v4502_v31, %v1314_v63  ;;  %v861_v16 = vsel %vm265_vm0, %v3317_v7, 0.0 }
 0x33e   : > { %v3319_v1 = vpop.eup %3318  ;;  %v1592_v58 = vpop.xlane.xlu0 %1591  ;;  %862 = vadd.xlane.f32.xlu0 %v861_v16 }
 0x33f   : > { %3332 = vpow2.f32 %v1346_v38  ;;  %v1344_v5 = vmul.f32 1.442695, %v1336_v12  ;;  %v1612_v45 = vsub.f32 %v4510_v2, %v1592_v58  ;;  %v858_v56 = vsel %vm265_vm0, %v3319_v1, 0.0 }
 0x340   : > { %v3321_v42 = vpop.eup %3320  ;;  %859 = vadd.xlane.f32.xlu1 %v858_v56  ;;  %v1589_v21 = vpop.xlane.xlu1 %1588 }
 0x341   : > { %3334 = vpow2.f32 %v1344_v5  ;;  %v1621_v23 = vmul.f32 1.442695, %v1612_v45  ;;  %v1611_v15 = vsub.f32 %v4514_v3, %v1589_v21  ;;  %v1118_v31 = vsel %vm265_vm0, %v3321_v42, 0.0 }
 0x342   : > { %v3323_v29 = vpop.eup %3322  ;;  %v1323_v37 = vpop.xlane.xlu0 %1322  ;;  %1119 = vadd.xlane.f32.xlu0 %v1118_v31 }
 0x343   : > { %3336 = vpow2.f32 %v1621_v23  ;;  %v1619_v24 = vmul.f32 1.442695, %v1611_v15  ;;  %v1339_v62 = vsub.f32 %v4517_v20, %v1323_v37  ;;  %v1115_v2 = vsel %vm265_vm0, %v3323_v29, 0.0 }
 0x344   : > { %v3325_v26 = vpop.eup %3324  ;;  %1116 = vadd.xlane.f32.xlu1 %v1115_v2  ;;  %v1320_v60 = vpop.xlane.xlu1 %1319 }
 0x345   : > { %3338 = vpow2.f32 %v1619_v24  ;;  %v1350_v0 = vmul.f32 1.442695, %v1339_v62  ;;  %v1338_v30 = vsub.f32 %v4521_v28, %v1320_v60  ;;  %v867_v3 = vsel %vm265_vm0, %v3325_v26, 0.0 }
 0x346   : > { %v3327_v53 = vpop.eup %3326  ;;  %v1598_v41 = vpop.xlane.xlu0 %1597  ;;  %868 = vadd.xlane.f32.xlu0 %v867_v3 }
 0x347   : > { %3340 = vpow2.f32 %v1350_v0  ;;  %v1348_v36 = vmul.f32 1.442695, %v1338_v30  ;;  %v1614_v18 = vsub.f32 %v4525_v25, %v1598_v41  ;;  %v864_v20 = vsel %vm265_vm0, %v3327_v53, 0.0 }
 0x348   : > { %v3329_v59 = vpop.eup %3328  ;;  %865 = vadd.xlane.f32.xlu1 %v864_v20  ;;  %v1595_v57 = vpop.xlane.xlu1 %1594 }
 0x349   : > { %3342 = vpow2.f32 %v1348_v36  ;;  %v1625_v19 = vmul.f32 1.442695, %v1614_v18  ;;  %v1613_v17 = vsub.f32 %v4529_v61, %v1595_v57  ;;  %v1124_v28 = vsel %vm265_vm0, %v3329_v59, 0.0 }
 0x34a   : > { %v3331_v7 = vpop.eup %3330  ;;  %v1329_v63 = vpop.xlane.xlu0 %1328  ;;  %1125 = vadd.xlane.f32.xlu0 %v1124_v28 }
 0x34b   : > { %3344 = vpow2.f32 %v1625_v19  ;;  %v1623_v38 = vmul.f32 1.442695, %v1613_v17  ;;  %v1341_v12 = vsub.f32 %v4535_v50, %v1329_v63  ;;  %v1121_v25 = vsel %vm265_vm0, %v3331_v7, 0.0 }
 0x34c   : > { %v3333_v16 = vpop.eup %3332  ;;  %1122 = vadd.xlane.f32.xlu1 %v1121_v25  ;;  %v1326_v1 = vpop.xlane.xlu1 %1325 }
 0x34d   : > { %3346 = vpow2.f32 %v1623_v38  ;;  %v1354_v58 = vmul.f32 1.442695, %v1341_v12  ;;  %v1340_v5 = vsub.f32 %v4540_v8, %v1326_v1  ;;  %v1363_v61 = vsel %vm265_vm0, %v3333_v16, 0.0 }
 0x34e   : > { %v3335_v45 = vpop.eup %3334  ;;  %v1604_v56 = vpop.xlane.xlu0 %1603  ;;  %1364 = vadd.xlane.f32.xlu0 %v1363_v61 }
 0x34f   : > { %3348 = vpow2.f32 %v1354_v58  ;;  %v1352_v42 = vmul.f32 1.442695, %v1340_v5  ;;  %v1616_v21 = vsub.f32 %v4546_v51, %v1604_v56  ;;  %v1360_v50 = vsel %vm265_vm0, %v3335_v45, 0.0 }
 0x350   : > { %v3337_v23 = vpop.eup %3336  ;;  %1361 = vadd.xlane.f32.xlu1 %v1360_v50  ;;  %v1601_v15 = vpop.xlane.xlu1 %1600 }
 0x351   : > { %3350 = vpow2.f32 %v1352_v42  ;;  %v1629_v31 = vmul.f32 1.442695, %v1616_v21  ;;  %v1615_v29 = vsub.f32 %v4550_v22, %v1601_v15  ;;  %v1638_v8 = vsel %vm265_vm0, %v3337_v23, 0.0 }
 0x352   : > { %v3339_v37 = vpop.eup %3338  ;;  %v4730_v24 = vpop.xlane.xlu0 %593  ;;  %1639 = vadd.xlane.f32.xlu0 %v1638_v8 }
 0x353   : > { %3352 = vpow2.f32 %v1629_v31  ;;  %v1627_v62 = vmul.f32 1.442695, %v1615_v29  ;;  %v1635_v2 = vsel %vm265_vm0, %v3339_v37, 0.0 }
 0x354   : > { %v3341_v51 = vpop.eup %3340  ;;  %1636 = vadd.xlane.f32.xlu1 %v1635_v2  ;;  %v4733_v26 = vpop.xlane.xlu1 %590 }
 0x355   : > { %3354 = vpow2.f32 %v1627_v62  ;;  %v1369_v60 = vsel %vm265_vm0, %v3341_v51, 0.0 }
 0x356   : > { %v3343_v0 = vpop.eup %3342  ;;  %v1335_v30 = vpop.xlane.xlu0 %1334  ;;  %1370 = vadd.xlane.f32.xlu0 %v1369_v60 }
 0x357   : > { %v1343_v22 = vsub.f32 %v4559_v49, %v1335_v30  ;;  %v1366_v3 = vsel %vm265_vm0, %v3343_v0, 0.0 }
 0x358   : > { %v3345_v53 = vpop.eup %3344  ;;  %1367 = vadd.xlane.f32.xlu1 %v1366_v3  ;;  %v1332_v41 = vpop.xlane.xlu1 %1331 }
 0x359   : > { %v1358_v36 = vmul.f32 1.442695, %v1343_v22  ;;  %v1342_v18 = vsub.f32 %v4562_v27, %v1332_v41  ;;  %v1644_v20 = vsel %vm265_vm0, %v3345_v53, 0.0 }
 0x35a   : > { %v3347_v59 = vpop.eup %3346  ;;  %v1610_v57 = vpop.xlane.xlu0 %1609  ;;  %1645 = vadd.xlane.f32.xlu0 %v1644_v20 }
 0x35b   : > { %3356 = vpow2.f32 %v1358_v36  ;;  %v1356_v19 = vmul.f32 1.442695, %v1342_v18  ;;  %v1618_v17 = vsub.f32 %v4566_v33, %v1610_v57  ;;  %v1641_v28 = vsel %vm265_vm0, %v3347_v59, 0.0 }
 0x35c   : > { %v3349_v49 = vpop.eup %3348  ;;  %1642 = vadd.xlane.f32.xlu1 %v1641_v28  ;;  %v1607_v7 = vpop.xlane.xlu1 %1606 }
 0x35d   : > { %3358 = vpow2.f32 %v1356_v19  ;;  %v1633_v63 = vmul.f32 1.442695, %v1618_v17  ;;  %v1617_v38 = vsub.f32 %v4570_v52, %v1607_v7  ;;  %v1375_v27 = vsel %vm265_vm0, %v3349_v49, 0.0 }
 0x35e   : > { %v3351_v12 = vpop.eup %3350  ;;  %v4744_v25 = vpop.xlane.xlu0 %599  ;;  %1376 = vadd.xlane.f32.xlu0 %v1375_v27 }
 0x35f   : > { %3360 = vpow2.f32 %v1633_v63  ;;  %v1631_v16 = vmul.f32 1.442695, %v1617_v38  ;;  %v1372_v1 = vsel %vm265_vm0, %v3351_v12, 0.0 }
 0x360   : > { %v3353_v33 = vpop.eup %3352  ;;  %1373 = vadd.xlane.f32.xlu1 %v1372_v1  ;;  %v4747_v58 = vpop.xlane.xlu1 %596 }
 0x361   : > { %3362 = vpow2.f32 %v1631_v16  ;;  %v1650_v5 = vsel %vm265_vm0, %v3353_v33, 0.0 }
 0x362   : > { %v3355_v61 = vpop.eup %3354  ;;  %v4750_v45 = vpop.xlane.xlu0 %605  ;;  %1651 = vadd.xlane.f32.xlu0 %v1650_v5 }
 0x363   : > { %v1647_v52 = vsel %vm265_vm0, %v3355_v61, 0.0 }
 0x364   : > { %1648 = vadd.xlane.f32.xlu1 %v1647_v52  ;;  %v4753_v56 = vpop.xlane.xlu1 %602 }
 0x366   : > { %v4755_v42 = vpop.xlane.xlu0 %611 }
 0x368   : > { %v3357_v21 = vpop.eup %3356  ;;  %v4757_v50 = vpop.xlane.xlu1 %608 }
 0x369   : > { %v1381_v23 = vsel %vm265_vm0, %v3357_v21, 0.0 }
 0x36a   : > { %v3359_v15 = vpop.eup %3358  ;;  %v1849_v31 = vpop.xlane.xlu0 %1848  ;;  %1382 = vadd.xlane.f32.xlu0 %v1381_v23 }
 0x36b   : > { %v1869_v29 = vsub.f32 %v4581_v35, %v1849_v31  ;;  %v1378_v8 = vsel %vm265_vm0, %v3359_v15, 0.0 }
 0x36c   : > { %v3361_v37 = vpop.eup %3360  ;;  %1379 = vadd.xlane.f32.xlu1 %v1378_v8  ;;  %v1846_v62 = vpop.xlane.xlu1 %1845 }
 0x36d   : > { %v1878_v2 = vmul.f32 1.442695, %v1869_v29  ;;  %v1868_v51 = vsub.f32 %v4584_v47, %v1846_v62  ;;  %v1656_v60 = vsel %vm265_vm0, %v3361_v37, 0.0 }
 0x36e   : > { %v3363_v0 = vpop.eup %3362  ;;  %v2106_v30 = vpop.xlane.xlu0 %2105  ;;  %1657 = vadd.xlane.f32.xlu0 %v1656_v60 }
 0x36f   : > { %3364 = vpow2.f32 %v1878_v2  ;;  %v1876_v22 = vmul.f32 1.442695, %v1868_v51  ;;  %v2126_v3 = vsub.f32 %v4588_v9, %v2106_v30  ;;  %v1653_v53 = vsel %vm265_vm0, %v3363_v0, 0.0  ;;  %v5275_v51 = vld [vmem:[#allocation37_spill] sm:$0xff] }
 0x370   : > { %1654 = vadd.xlane.f32.xlu1 %v1653_v53  ;;  %v2103_v35 = vpop.xlane.xlu1 %2102 }
 0x371   : > { %3366 = vpow2.f32 %v1876_v22  ;;  %v2135_v41 = vmul.f32 1.442695, %v2126_v3  ;;  %v2125_v36 = vsub.f32 %v4592_v34, %v2103_v35  ;;  %v5276_v3 = vld [vmem:[#allocation38_spill] sm:$0xff] }
 0x372   : > { %v1855_v18 = vpop.xlane.xlu0 %1854 }
 0x373   : > { %3368 = vpow2.f32 %v2135_v41  ;;  %v2133_v47 = vmul.f32 1.442695, %v2125_v36  ;;  %v1871_v20 = vsub.f32 %v4596_v46, %v1855_v18 }
 0x374   : > { %v1852_v59 = vpop.xlane.xlu1 %1851 }
 0x375   : > { %3370 = vpow2.f32 %v2133_v47  ;;  %v1882_v57 = vmul.f32 1.442695, %v1871_v20  ;;  %v1870_v19 = vsub.f32 %v4600_v48, %v1852_v59 }
 0x376   : > { %v2112_v17 = vpop.xlane.xlu0 %2111 }
 0x377   : > { %3372 = vpow2.f32 %v1882_v57  ;;  %v1880_v9 = vmul.f32 1.442695, %v1870_v19  ;;  %v2128_v28 = vsub.f32 %v4606_v11, %v2112_v17  ;;  %v5277_v19 = vld [vmem:[#allocation39_spill] sm:$0xff] }
 0x378   : > { %v2109_v49 = vpop.xlane.xlu1 %2108 }
 0x379   : > { %3374 = vpow2.f32 %v1880_v9  ;;  %v2139_v7 = vmul.f32 1.442695, %v2128_v28  ;;  %v2127_v34 = vsub.f32 %v4610_v55, %v2109_v49 }
 0x37a   : > { %v1861_v63 = vpop.xlane.xlu0 %1860 }
 0x37b   : > { %3376 = vpow2.f32 %v2139_v7  ;;  %v2137_v38 = vmul.f32 1.442695, %v2127_v34  ;;  %v1873_v46 = vsub.f32 %v4614_v44, %v1861_v63 }
 0x37c   : > { %v3365_v27 = vpop.eup %3364  ;;  %v1858_v12 = vpop.xlane.xlu1 %1857 }
 0x37d   : > { %3378 = vpow2.f32 %v2137_v38  ;;  %v1886_v16 = vmul.f32 1.442695, %v1873_v46  ;;  %v1872_v48 = vsub.f32 %v4618_v14, %v1858_v12  ;;  %v1895_v1 = vsel %vm265_vm0, %v3365_v27, 0.0 }
 0x37e   : > { %v3367_v33 = vpop.eup %3366  ;;  %v2118_v11 = vpop.xlane.xlu0 %2117  ;;  %1896 = vadd.xlane.f32.xlu0 %v1895_v1 }
 0x37f   : > { %3380 = vpow2.f32 %v1886_v16  ;;  %v1884_v5 = vmul.f32 1.442695, %v1872_v48  ;;  %v2130_v55 = vsub.f32 %v4622_v39, %v2118_v11  ;;  %v1892_v61 = vsel %vm265_vm0, %v3367_v33, 0.0 }
 0x380   : > { %v3369_v52 = vpop.eup %3368  ;;  %1893 = vadd.xlane.f32.xlu1 %v1892_v61  ;;  %v2115_v44 = vpop.xlane.xlu1 %2114 }
 0x381   : > { %3382 = vpow2.f32 %v1884_v5  ;;  %v2143_v21 = vmul.f32 1.442695, %v2130_v55  ;;  %v2129_v23 = vsub.f32 %v4626_v54, %v2115_v44  ;;  %v2152_v14 = vsel %vm265_vm0, %v3369_v52, 0.0 }
 0x382   : > { %v3371_v15 = vpop.eup %3370  ;;  %v1867_v31 = vpop.xlane.xlu0 %1866  ;;  %2153 = vadd.xlane.f32.xlu0 %v2152_v14 }
 0x383   : > { %3384 = vpow2.f32 %v2143_v21  ;;  %v2141_v29 = vmul.f32 1.442695, %v2129_v23  ;;  %v1875_v8 = vsub.f32 %v4630_v40, %v1867_v31  ;;  %v2149_v39 = vsel %vm265_vm0, %v3371_v15, 0.0  ;;  %v5278_v23 = vld [vmem:[#allocation40_spill] sm:$0xff] }
 0x384   : > { %v3373_v37 = vpop.eup %3372  ;;  %2150 = vadd.xlane.f32.xlu1 %v2149_v39  ;;  %v1864_v62 = vpop.xlane.xlu1 %1863 }
 0x385   : > { %3386 = vpow2.f32 %v2141_v29  ;;  %v1890_v2 = vmul.f32 1.442695, %v1875_v8  ;;  %v1874_v60 = vsub.f32 %v5275_v51, %v1864_v62  ;;  %v1901_v54 = vsel %vm265_vm0, %v3373_v37, 0.0  ;;  %v5279_v8 = vld [vmem:[#allocation41_spill] sm:$0xff] }
 0x386   : > { %v3375_v0 = vpop.eup %3374  ;;  %v2124_v30 = vpop.xlane.xlu0 %2123  ;;  %1902 = vadd.xlane.f32.xlu0 %v1901_v54 }
 0x387   : > { %3388 = vpow2.f32 %v1890_v2  ;;  %v1888_v22 = vmul.f32 1.442695, %v1874_v60  ;;  %v2132_v53 = vsub.f32 %v5276_v3, %v2124_v30  ;;  %v1898_v40 = vsel %vm265_vm0, %v3375_v0, 0.0 }
 0x388   : > { %v3377_v35 = vpop.eup %3376  ;;  %1899 = vadd.xlane.f32.xlu1 %v1898_v40  ;;  %v2121_v41 = vpop.xlane.xlu1 %2120 }
 0x389   : > { %3390 = vpow2.f32 %v1888_v22  ;;  %v2147_v36 = vmul.f32 1.442695, %v2132_v53  ;;  %v2131_v18 = vsub.f32 %v4644_v32, %v2121_v41  ;;  %v2158_v47 = vsel %vm265_vm0, %v3377_v35, 0.0 }
 0x38a   : > { %v3379_v20 = vpop.eup %3378  ;;  %v2363_v59 = vpop.xlane.xlu0 %2362  ;;  %2159 = vadd.xlane.f32.xlu0 %v2158_v47 }
 0x38b   : > { %3392 = vpow2.f32 %v2147_v36  ;;  %v2145_v57 = vmul.f32 1.442695, %v2131_v18  ;;  %v2383_v17 = vsub.f32 %v5277_v19, %v2363_v59  ;;  %v2155_v9 = vsel %vm265_vm0, %v3379_v20, 0.0 }
 0x38c   : > { %v3381_v28 = vpop.eup %3380  ;;  %2156 = vadd.xlane.f32.xlu1 %v2155_v9  ;;  %v2360_v49 = vpop.xlane.xlu1 %2359 }
 0x38d   : > { %3394 = vpow2.f32 %v2145_v57  ;;  %v2392_v7 = vmul.f32 1.442695, %v2383_v17  ;;  %v2382_v34 = vsub.f32 %v4653_v10, %v2360_v49  ;;  %v1907_v32 = vsel %vm265_vm0, %v3381_v28, 0.0 }
 0x38e   : > { %v3383_v63 = vpop.eup %3382  ;;  %v2369_v38 = vpop.xlane.xlu0 %2368  ;;  %1908 = vadd.xlane.f32.xlu0 %v1907_v32 }
 0x38f   : > { %3396 = vpow2.f32 %v2392_v7  ;;  %v2390_v46 = vmul.f32 1.442695, %v2382_v34  ;;  %v2385_v27 = vsub.f32 %v4657_v6, %v2369_v38  ;;  %v1904_v12 = vsel %vm265_vm0, %v3383_v63, 0.0 }
 0x390   : > { %v3385_v16 = vpop.eup %3384  ;;  %1905 = vadd.xlane.f32.xlu1 %v1904_v12  ;;  %v2366_v48 = vpop.xlane.xlu1 %2365 }
 0x391   : > { %3398 = vpow2.f32 %v2390_v46  ;;  %v2396_v1 = vmul.f32 1.442695, %v2385_v27  ;;  %v2384_v33 = vsub.f32 %v4661_v43, %v2366_v48  ;;  %v2164_v10 = vsel %vm265_vm0, %v3385_v16, 0.0 }
 0x392   : > { %v3387_v11 = vpop.eup %3386  ;;  %v2375_v5 = vpop.xlane.xlu0 %2374  ;;  %2165 = vadd.xlane.f32.xlu0 %v2164_v10 }
 0x393   : > { %3400 = vpow2.f32 %v2396_v1  ;;  %v2394_v55 = vmul.f32 1.442695, %v2384_v33  ;;  %v2387_v61 = vsub.f32 %v4665_v13, %v2375_v5  ;;  %v2161_v6 = vsel %vm265_vm0, %v3387_v11, 0.0 }
 0x394   : > { %v3389_v52 = vpop.eup %3388  ;;  %2162 = vadd.xlane.f32.xlu1 %v2161_v6  ;;  %v2372_v44 = vpop.xlane.xlu1 %2371 }
 0x395   : > { %3402 = vpow2.f32 %v2394_v55  ;;  %v2400_v21 = vmul.f32 1.442695, %v2387_v61  ;;  %v2386_v14 = vsub.f32 %v5278_v23, %v2372_v44  ;;  %v1913_v43 = vsel %vm265_vm0, %v3389_v52, 0.0 }
 0x396   : > { %v3391_v15 = vpop.eup %3390  ;;  %1914 = vadd.xlane.f32.xlu0 %v1913_v43  ;;  %v2381_v31 = vpop.xlane.xlu0 %2380 }
 0x397   : > { %3404 = vpow2.f32 %v2400_v21  ;;  %v2398_v29 = vmul.f32 1.442695, %v2386_v14  ;;  %v2389_v39 = vsub.f32 %v5279_v8, %v2381_v31  ;;  %v1910_v13 = vsel %vm265_vm0, %v3391_v15, 0.0 }
 0x398   : > { %v3393_v37 = vpop.eup %3392  ;;  %1911 = vadd.xlane.f32.xlu1 %v1910_v13  ;;  %v2378_v62 = vpop.xlane.xlu1 %2377 }
 0x399   : > { %3406 = vpow2.f32 %v2398_v29  ;;  %v2404_v2 = vmul.f32 1.442695, %v2389_v39  ;;  %v2388_v51 = vsub.f32 %v4677_v4, %v2378_v62  ;;  %v2170_v60 = vsel %vm265_vm0, %v3393_v37, 0.0 }
 0x39a   : > { %v3395_v54 = vpop.eup %3394  ;;  %2171 = vadd.xlane.f32.xlu0 %v2170_v60 }
 0x39b   : > { %3408 = vpow2.f32 %v2404_v2  ;;  %v2402_v0 = vmul.f32 1.442695, %v2388_v51  ;;  %v2167_v30 = vsel %vm265_vm0, %v3395_v54, 0.0 }
 0x39c   : > { %v3397_v22 = vpop.eup %3396  ;;  %2168 = vadd.xlane.f32.xlu1 %v2167_v30 }
 0x39d   : > { %3410 = vpow2.f32 %v2402_v0  ;;  %v2409_v3 = vsel %vm265_vm0, %v3397_v22, 0.0 }
 0x39e   : > { %v3399_v53 = vpop.eup %3398  ;;  %2410 = vadd.xlane.f32.xlu0 %v2409_v3  ;;  %3412 = vrcp.f32 %v4730_v24  ;;  %v4867_v3 = vstv %s3841_s24 }
 0x39f   : > { %v2406_v40 = vsel %vm265_vm0, %v3399_v53, 0.0 }
 0x3a0   : > { %v3401_v35 = vpop.eup %3400  ;;  %2407 = vadd.xlane.f32.xlu1 %v2406_v40 }
 0x3a1   : > { %v2415_v4 = vsel %vm265_vm0, %v3401_v35, 0.0 }
 0x3a2   : > { %v3403_v41 = vpop.eup %3402  ;;  %2416 = vadd.xlane.f32.xlu0 %v2415_v4 }
 0x3a3   : > { %v2412_v36 = vsel %vm265_vm0, %v3403_v41, 0.0 }
 0x3a4   : > { %v3405_v18 = vpop.eup %3404  ;;  %2413 = vadd.xlane.f32.xlu1 %v2412_v36 }
 0x3a5   : > { %v2421_v47 = vsel %vm265_vm0, %v3405_v18, 0.0  ;;  %v3540_v18 = vld [vmem:[%s3831_s28 + $0x8] sm:$0xff] }
 0x3a6   : > { %v3407_v20 = vpop.eup %3406  ;;  %2422 = vadd.xlane.f32.xlu0 %v2421_v47  ;;  %v5280_v47 = vld [vmem:[#allocation12_spill] sm:$0xff] }
 0x3a7   : > { %v2418_v59 = vsel %vm265_vm0, %v3407_v20, 0.0  ;;  %v2517_v20 = vmul.f32 %v3540_v18, %v5280_v47 }
 0x3a8   : > { %v3409_v57 = vpop.eup %3408  ;;  %2419 = vadd.xlane.f32.xlu1 %v2418_v59 }
 0x3a9   : > { %v2427_v19 = vsel %vm265_vm0, %v3409_v57, 0.0  ;;  %v5281_v57 = vld [vmem:[#allocation24_spill] sm:$0xff] }
 0x3aa   : > { %v3411_v17 = vpop.eup %3410  ;;  %2428 = vadd.xlane.f32.xlu0 %v2427_v19  ;;  %v851_v28 = vpop.xlane.xlu0 %850 }
 0x3ab   : > { %v2424_v9 = vsel %vm265_vm0, %v3411_v17, 0.0  ;;  %3414 = vrcp.f32 %v851_v28  ;;  %v3413_v52 = vpop.eup %3412 }
 0x3ac   : > { %2425 = vadd.xlane.f32.xlu1 %v2424_v9  ;;  %v848_v49 = vpop.xlane.xlu1 %847  ;;  %v630_v37 = vmul.f32 %v3413_v52, %v4730_v24 }
 0x3b8   : > { %v3415_v44 = vpop.eup %3414 }
 0x3b9   : > { %v887_v31 = vmul.f32 %v3415_v44, %v851_v28  ;;  %v5282_v44 = vld [vmem:[#allocation22_spill] sm:$0xff] }
 0x3bb   : > { %v1108_v7 = vpop.xlane.xlu0 %1107  ;;  %v1409_v30 = vsel %vm387_vm1, %v630_v37, %v887_v31 }
 0x3bc   : > { %3416 = vrcp.f32 %v1108_v7 }
 0x3bd   : > { %v1105_v34 = vpop.xlane.xlu1 %1104  ;;  %3418 = vrcp.f32 %v848_v49 }
 0x3be   : > { %3420 = vrcp.f32 %v1105_v34 }
 0x3bf   : > { %v4811_v32 = vpop.xlane.xlu0 %856  ;;  %3422 = vrcp.f32 %v4733_v26 }
 0x3c0   : > { %3424 = vrcp.f32 %v4744_v25 }
 0x3c1   : > { %v4813_v63 = vpop.xlane.xlu1 %853 }
 0x3c3   : > { %v4815_v38 = vpop.xlane.xlu0 %1113 }
 0x3c5   : > { %v4817_v46 = vpop.xlane.xlu1 %1110 }
 0x3c7   : > { %v4819_v27 = vpop.xlane.xlu0 %862 }
 0x3c9   : > { %v4821_v12 = vpop.xlane.xlu1 %859  ;;  %v3417_v23 = vpop.eup %3416 }
 0x3ca   : > { %v3419_v14 = vpop.eup %3418  ;;  %v1144_v8 = vmul.f32 %v3417_v23, %v1108_v7 }
 0x3cb   : > { %v4823_v16 = vpop.xlane.xlu0 %1119  ;;  %v3421_v15 = vpop.eup %3420  ;;  %v886_v62 = vmul.f32 %v3419_v14, %v848_v49 }
 0x3cc   : > { %v3423_v29 = vpop.eup %3422  ;;  %v1143_v51 = vmul.f32 %v3421_v15, %v1105_v34  ;;  %v1418_v53 = vsel %vm1416_vm10, %v1409_v30, %v1144_v8  ;;  %v3541_v34 = vld [vmem:[%s3831_s28] sm:$0xff] }
 0x3cd   : > { %v4825_v48 = vpop.xlane.xlu1 %1116  ;;  %v3425_v13 = vpop.eup %3424  ;;  %v629_v0 = vmul.f32 %v3423_v29, %v4733_v26 }
 0x3ce   : > { %v632_v15 = vmul.f32 %v3425_v13, %v4744_v25 }
 0x3cf   : > { %v4827_v1 = vpop.xlane.xlu0 %868  ;;  %v1408_v4 = vsel %vm387_vm1, %v629_v0, %v886_v62 }
 0x3d0   : > { %v1417_v59 = vsel %vm1416_vm10, %v1408_v4, %v1143_v51 }
 0x3d1   : > { %v4830_v33 = vpop.xlane.xlu1 %865 }
 0x3d3   : > { %v4832_v10 = vpop.xlane.xlu0 %1125 }
 0x3d5   : > { %v4834_v11 = vpop.xlane.xlu1 %1122 }
 0x3d7   : > { %v1365_v5 = vpop.xlane.xlu0 %1364 }
 0x3d8   : > { %3426 = vrcp.f32 %v1365_v5 }
 0x3d9   : > { %3428 = vrcp.f32 %v4811_v32  ;;  %v1362_v55 = vpop.xlane.xlu1 %1361 }
 0x3da   : > { %3430 = vrcp.f32 %v1362_v55 }
 0x3db   : > { %3432 = vrcp.f32 %v4815_v38  ;;  %v4840_v61 = vpop.xlane.xlu0 %1639 }
 0x3dc   : > { %3434 = vrcp.f32 %v4813_v63 }
 0x3dd   : > { %3436 = vrcp.f32 %v4817_v46  ;;  %v4844_v6 = vpop.xlane.xlu1 %1636 }
 0x3de   : > { %3438 = vrcp.f32 %v4747_v58 }
 0x3df   : > { %3440 = vrcp.f32 %v4750_v45  ;;  %v4848_v21 = vpop.xlane.xlu0 %1370 }
 0x3e0   : > { %3442 = vrcp.f32 %v4848_v21 }
 0x3e1   : > { %3444 = vrcp.f32 %v4819_v27  ;;  %v4852_v43 = vpop.xlane.xlu1 %1367 }
 0x3e2   : > { %3446 = vrcp.f32 %v4852_v43 }
 0x3e3   : > { %3448 = vrcp.f32 %v4823_v16  ;;  %v4856_v39 = vpop.xlane.xlu0 %1645 }
 0x3e4   : > { %3450 = vrcp.f32 %v4821_v12 }
 0x3e5   : > { %v3427_v2 = vpop.eup %3426  ;;  %3452 = vrcp.f32 %v4825_v48  ;;  %v4861_v60 = vpop.xlane.xlu1 %1642 }
 0x3e6   : > { %v3429_v54 = vpop.eup %3428  ;;  %3454 = vrcp.f32 %v4753_v56  ;;  %v1401_v24 = vmul.f32 %v3427_v2, %v1365_v5  ;;  %v2516_v5 = vmul.f32 %v3541_v34, %v5280_v47 }
 0x3e7   : > { %v3431_v22 = vpop.eup %3430  ;;  %v4870_v40 = vpop.xlane.xlu0 %1376  ;;  %v889_v28 = vmul.f32 %v3429_v54, %v4811_v32 }
 0x3e8   : > { %v3433_v35 = vpop.eup %3432  ;;  %v1427_v41 = vsel %vm1425_vm11, %v1418_v53, %v1401_v24  ;;  %v1400_v36 = vmul.f32 %v3431_v22, %v1362_v55  ;;  %3456 = vrcp.f32 %v4870_v40  ;;  %v3542_v24 = vld [vmem:[%s3831_s28 + $0x18] sm:$0xff] }
 0x3e9   : > { %v3435_v26 = vpop.eup %3434  ;;  %v2479_v19 = vmul.f32 %v1427_v41, %v5281_v57  ;;  %v4879_v17 = vpop.xlane.xlu1 %1373  ;;  %v1146_v55 = vmul.f32 %v3433_v35, %v4815_v38  ;;  %v1411_v2 = vsel %vm387_vm1, %v632_v15, %v889_v28  ;;  %v2519_v22 = vmul.f32 %v3542_v24, %v5280_v47  ;;  %v5283_v35 = vld [vmem:[#allocation23_spill] sm:$0xff] }
 0x3ea   : > { %v3437_v9 = vpop.eup %3436  ;;  %v1426_v49 = vsel %vm1425_vm11, %v1417_v59, %v1400_v36  ;;  %3458 = vrcp.f32 %v4879_v17  ;;  %v888_v32 = vmul.f32 %v3435_v26, %v4813_v63 }
 0x3eb   : > { %v3439_v7 = vpop.eup %3438  ;;  %v2499_v52 = vmul.f32 %v4867_v3, %v2479_v19  ;;  %v2478_v23 = vmul.f32 %v1426_v49, %v5282_v44  ;;  %3460 = vrcp.f32 %v4755_v42  ;;  %v1145_v29 = vmul.f32 %v3437_v9, %v4817_v46  ;;  %v4906_v46 = vpop.xlane.xlu0 %1651  ;;  %v5284_v9 = vld [vmem:[#allocation21_spill] sm:$0xff] }
 0x3ec   : > { %v3441_v14 = vpop.eup %3440  ;;  %v631_v38 = vmul.f32 %v3439_v7, %v4747_v58  ;;  %3462 = vrcp.f32 %v4827_v1  ;;  %v1420_v63 = vsel %vm1416_vm10, %v1411_v2, %v1146_v55 }
 0x3ed   : > { %v3443_v31 = vpop.eup %3442  ;;  %v2533_v8 = vadd.f32 %v2517_v20, %v2499_v52  ;;  %v2498_v37 = vmul.f32 %v4867_v3, %v2478_v23  ;;  %3464 = vrcp.f32 %v4832_v10  ;;  %v4919_v41 = vpop.xlane.xlu1 %1648  ;;  %v3543_v20 = vld [vmem:[%s3831_s28 + $0x10] sm:$0xff]  ;;  %v634_v7 = vmul.f32 %v3441_v14, %v4750_v45 }
 0x3ee   : > { %v3445_v62 = vpop.eup %3444  ;;  %v1403_v25 = vmul.f32 %v3443_v31, %v4848_v21  ;;  %v1410_v54 = vsel %vm387_vm1, %v631_v38, %v888_v32  ;;  %3466 = vrcp.f32 %v4830_v33  ;;  %v2518_v59 = vmul.f32 %v3543_v20, %v5280_v47 }
 0x3ef   : > { %v3447_v13 = vpop.eup %3446  ;;  %2549 = vst.msk [vmem:[%s4902_s5 + $0x8] sm:$0xff] %vm265_vm0, %v2533_v8  ;;  %v2532_v58 = vadd.f32 %v2516_v5, %v2498_v37  ;;  %v1419_v53 = vsel %vm1416_vm10, %v1410_v54, %v1145_v29  ;;  %3468 = vrcp.f32 %v4834_v11  ;;  %v891_v26 = vmul.f32 %v3445_v62, %v4819_v27  ;;  %v3544_v29 = vld [vmem:[%s3831_s28 + $0x28] sm:$0xff] }
 0x3f0   : > { %v3449_v51 = vpop.eup %3448  ;;  %v1429_v21 = vsel %vm1425_vm11, %v1420_v63, %v1403_v25  ;;  %v1402_v0 = vmul.f32 %v3447_v13, %v4852_v43  ;;  %3470 = vrcp.f32 %v4757_v50  ;;  %v3545_v25 = vld [vmem:[%s3831_s28 + $0x20] sm:$0xff] }
 0x3f1   : > { %v3451_v30 = vpop.eup %3450  ;;  %2548 = vst.msk [vmem:[%s4902_s5] sm:$0xff] %vm265_vm0, %v2532_v58  ;;  %v2481_v4 = vmul.f32 %v5283_v35, %v1429_v21  ;;  %v1148_v57 = vmul.f32 %v3449_v51, %v4823_v16  ;;  %v1413_v23 = vsel %vm387_vm1, %v634_v7, %v891_v26  ;;  %v2520_v13 = vmul.f32 %v3545_v25, %v5280_v47 }
 0x3f2   : > { %v3453_v36 = vpop.eup %3452  ;;  %v1428_v43 = vsel %vm1425_vm11, %v1419_v53, %v1402_v0  ;;  %v890_v34 = vmul.f32 %v3451_v30, %v4821_v12 }
 0x3f3   : > { %v3455_v18 = vpop.eup %3454  ;;  %v2501_v19 = vmul.f32 %v4867_v3, %v2481_v4  ;;  %v2480_v28 = vmul.f32 %v5284_v9, %v1428_v43  ;;  %v1383_v49 = vpop.xlane.xlu0 %1382  ;;  %v1147_v5 = vmul.f32 %v3453_v36, %v4825_v48  ;;  %v1422_v12 = vsel %vm1416_vm10, %v1413_v23, %v1148_v57 }
 0x3f4   : > { %3472 = vrcp.f32 %v1383_v49  ;;  %v633_v44 = vmul.f32 %v3455_v18, %v4753_v56  ;;  %v2521_v56 = vmul.f32 %v3544_v29, %v5280_v47 }
 0x3f5   : > { %v3457_v27 = vpop.eup %3456  ;;  %v2535_v55 = vadd.f32 %v2519_v22, %v2501_v19  ;;  %v2500_v52 = vmul.f32 %v4867_v3, %v2480_v28  ;;  %v1380_v16 = vpop.xlane.xlu1 %1379  ;;  %v5287_v28 = vld [vmem:[#allocation27_spill] sm:$0xff] }
 0x3f6   : > { %v1405_v15 = vmul.f32 %v3457_v27, %v4870_v40  ;;  %3474 = vrcp.f32 %v1380_v16  ;;  %v1412_v48 = vsel %vm387_vm1, %v633_v44, %v890_v34  ;;  %v5285_v40 = vld [vmem:[#allocation28_spill] sm:$0xff]  ;;  %v3547_v27 = vld [vmem:[%s3831_s28 + $0x30] sm:$0xff] }
 0x3f7   : > { %v3459_v45 = vpop.eup %3458  ;;  %2551 = vst.msk [vmem:[%s4902_s5 + $0x18] sm:$0xff] %vm265_vm0, %v2535_v55  ;;  %v2534_v14 = vadd.f32 %v2518_v59, %v2500_v52  ;;  %v1421_v8 = vsel %vm1416_vm10, %v1412_v48, %v1147_v5  ;;  %v4966_v57 = vpop.xlane.xlu0 %1657  ;;  %v2522_v5 = vmul.f32 %v3547_v27, %v5280_v47  ;;  %v5288_v52 = vld [vmem:[#allocation25_spill] sm:$0xff]  ;;  %3476 = vrcp.f32 %v4840_v61 }
 0x3f8   : > { %v1431_v32 = vsel %vm1425_vm11, %v1422_v12, %v1405_v15  ;;  %v1404_v31 = vmul.f32 %v3459_v45, %v4879_v17  ;;  %v3461_v62 = vpop.eup %3460  ;;  %v5286_v17 = vld [vmem:[#allocation26_spill] sm:$0xff]  ;;  %3478 = vrcp.f32 %v4844_v6 }
 0x3f9   : > { %2550 = vst.msk [vmem:[%s4902_s5 + $0x10] sm:$0xff] %vm265_vm0, %v2534_v14  ;;  %v2483_v37 = vmul.f32 %v1431_v32, %v5285_v40  ;;  %v3463_v2 = vpop.eup %3462  ;;  %v636_v4 = vmul.f32 %v3461_v62, %v4755_v42  ;;  %3480 = vrcp.f32 %v4856_v39 }
 0x3fa   : > { %v1430_v38 = vsel %vm1425_vm11, %v1421_v8, %v1404_v31  ;;  %v3465_v51 = vpop.eup %3464  ;;  %v893_v24 = vmul.f32 %v3463_v2, %v4827_v1  ;;  %3482 = vrcp.f32 %v4861_v60 }
 0x3fb   : > { %v2503_v63 = vmul.f32 %v4867_v3, %v2483_v37  ;;  %v2482_v58 = vmul.f32 %v1430_v38, %v5286_v17  ;;  %v3467_v54 = vpop.eup %3466  ;;  %v1150_v53 = vmul.f32 %v3465_v51, %v4832_v10  ;;  %3484 = vrcp.f32 %v4906_v46 }
 0x3fc   : > { %v3469_v30 = vpop.eup %3468  ;;  %v892_v36 = vmul.f32 %v3467_v54, %v4830_v33  ;;  %v1415_v1 = vsel %vm387_vm1, %v636_v4, %v893_v24  ;;  %3486 = vrcp.f32 %v4919_v41 }
 0x3fd   : > { %v2537_v21 = vadd.f32 %v2521_v56, %v2503_v63  ;;  %v2502_v0 = vmul.f32 %v4867_v3, %v2482_v58  ;;  %v3471_v22 = vpop.eup %3470  ;;  %v1149_v43 = vmul.f32 %v3469_v30, %v4834_v11  ;;  %v1424_v59 = vsel %vm1416_vm10, %v1415_v1, %v1150_v53  ;;  %v3546_v11 = vld [vmem:[%s3831_s28 + $0x38] sm:$0xff]  ;;  %s3606_s28 = sshll.u32 %s3683_s27, 4  ;;  %s3607_s28 = int_to_ptr.vmem [resolvable:$false] %s3606_s28 }
 0x3fe   : > { %v635_v18 = vmul.f32 %v3471_v22, %v4757_v50  ;;  %v2523_v9 = vmul.f32 %v3546_v11, %v5280_v47  ;;  %3488 = vrcp.f32 %v4966_v57  ;;  %s3608_s21 = scalar_lea.vmem %s3607_s28, 4096  ;;  %p3609_p10 = scmp.lt.s32.totalorder %s5155_s9, %s3607_s28 }
 0x3ff   : > { %2553 = vst.msk [vmem:[%s4902_s5 + $0x28] sm:$0xff] %vm265_vm0, %v2537_v21  ;;  %v2536_v35 = vadd.f32 %v2520_v13, %v2502_v0  ;;  %p3610_p2 = scmp.lt.s32.totalorder %s3608_s21, %s3602_s26 }
 0x400   : > { %v1414_v42 = vsel %vm387_vm1, %v635_v18, %v892_v36 }
 0x401   : > { %v3473_v26 = vpop.eup %3472  ;;  %2552 = vst.msk [vmem:[%s4902_s5 + $0x20] sm:$0xff] %vm265_vm0, %v2536_v35  ;;  %v1423_v50 = vsel %vm1416_vm10, %v1414_v42, %v1149_v43  ;;  %p3611_p13 = por %p3610_p2, %p3609_p10 }
 0x402   : > { %v1407_v20 = vmul.f32 %v3473_v26, %v1383_v49  ;;  %v4974_v49 = vpop.xlane.xlu1 %1654 }
 0x403   : > { %v3475_v10 = vpop.eup %3474  ;;  %3490 = vrcp.f32 %v4974_v49  ;;  %p3612_p0 = pnand %p3611_p13, %p3605_p12 }
 0x404   : > { %v1433_v33 = vsel %vm1425_vm11, %v1424_v59, %v1407_v20  ;;  %v1406_v19 = vmul.f32 %v3475_v10, %v1380_v16  ;;  %v3477_v2 = vpop.eup %3476 }
 0x405   : > { %v2485_v7 = vmul.f32 %v5287_v28, %v1433_v33  ;;  %v3479_v25 = vpop.eup %3478  ;;  %v1676_v11 = vmul.f32 %v3477_v2, %v4840_v61 }
 0x406   : > { %v1432_v34 = vsel %vm1425_vm11, %v1423_v50, %v1406_v19  ;;  %v3481_v63 = vpop.eup %3480 }
 0x407   : > { %v2505_v55 = vmul.f32 %v4867_v3, %v2485_v7  ;;  %v2484_v44 = vmul.f32 %v5288_v52, %v1432_v34  ;;  %v4981_v16 = vpop.xlane.xlu0 %1896  ;;  %v3483_v17 = vpop.eup %3482  ;;  %v1678_v34 = vmul.f32 %v3481_v63, %v4856_v39 }
 0x408   : > { %3492 = vrcp.f32 %v4981_v16  ;;  %v3485_v51 = vpop.eup %3484  ;;  %v1677_v27 = vmul.f32 %v3483_v17, %v4861_v60 }
 0x409   : > { %v2539_v23 = vadd.f32 %v2523_v9, %v2505_v55  ;;  %v2504_v15 = vmul.f32 %v4867_v3, %v2484_v44  ;;  %v4984_v45 = vpop.xlane.xlu1 %1893  ;;  %v3487_v54 = vpop.eup %3486  ;;  %v1675_v9 = vmul.f32 %v3479_v25, %v4844_v6  ;;  %v1680_v52 = vmul.f32 %v3485_v51, %v4906_v46 }
 0x40a   : > { %3494 = vrcp.f32 %v4984_v45  ;;  %v1679_v61 = vmul.f32 %v3487_v54, %v4919_v41  ;;  %v5289_v54 = vld [vmem:[#allocation32_spill] sm:$0xff] }
 0x40b   : > { %2555 = vst.msk [vmem:[%s4902_s5 + $0x38] sm:$0xff] %vm265_vm0, %v2539_v23  ;;  %v2538_v12 = vadd.f32 %v2522_v5, %v2504_v15  ;;  %v4988_v14 = vpop.xlane.xlu0 %2153  ;;  %v3489_v0 = vpop.eup %3488 }
 0x40c   : > { %3496 = vrcp.f32 %v4988_v14 }
 0x40d   : > { %2554 = vst.msk [vmem:[%s4902_s5 + $0x30] sm:$0xff] %vm265_vm0, %v2538_v12  ;;  %v4992_v48 = vpop.xlane.xlu1 %2150  ;;  %v1682_v12 = vmul.f32 %v3489_v0, %v4966_v57 }
 0x40e   : > { %3498 = vrcp.f32 %v4992_v48 }
 0x40f   : > { %v4994_v47 = vpop.xlane.xlu0 %1902 }
 0x410   : > { %3500 = vrcp.f32 %v4994_v47  ;;  %v5037_v30 = vpop.eup %3490 }
 0x411   : > { %v4996_v32 = vpop.xlane.xlu1 %1899 }
 0x412   : > { %3502 = vrcp.f32 %v4996_v32 }
 0x413   : > { %v4998_v31 = vpop.xlane.xlu0 %2159 }
 0x414   : > { %3504 = vrcp.f32 %v4998_v31 }
 0x415   : > { %v5001_v29 = vpop.xlane.xlu1 %2156  ;;  %v3493_v22 = vpop.eup %3492 }
 0x416   : > { %3506 = vrcp.f32 %v5001_v29  ;;  %v1933_v33 = vmul.f32 %v3493_v22, %v4981_v16 }
 0x417   : > { %v5005_v56 = vpop.xlane.xlu0 %1908  ;;  %v3495_v53 = vpop.eup %3494 }
 0x418   : > { %3508 = vrcp.f32 %v5005_v56  ;;  %v1932_v5 = vmul.f32 %v3495_v53, %v4984_v45  ;;  %v2455_v39 = vsel %vm387_vm1, %v1676_v11, %v1933_v33 }
 0x419   : > { %v5009_v8 = vpop.xlane.xlu1 %1905  ;;  %v3497_v4 = vpop.eup %3496 }
 0x41a   : > { %3510 = vrcp.f32 %v5009_v8  ;;  %v2190_v50 = vmul.f32 %v3497_v4, %v4988_v14 }
 0x41b   : > { %v5013_v40 = vpop.xlane.xlu0 %2165  ;;  %v3499_v36 = vpop.eup %3498 }
 0x41c   : > { %3512 = vrcp.f32 %v5013_v40  ;;  %v2189_v6 = vmul.f32 %v3499_v36, %v4992_v48  ;;  %v2463_v46 = vsel %vm1416_vm10, %v2455_v39, %v2190_v50  ;;  %v5292_v50 = vld [vmem:[#allocation31_spill] sm:$0xff] }
 0x41d   : > { %v5017_v37 = vpop.xlane.xlu1 %2162  ;;  %v3501_v43 = vpop.eup %3500 }
 0x41e   : > { %v1935_v44 = vmul.f32 %v3501_v43, %v4994_v47  ;;  %v2454_v47 = vsel %vm387_vm1, %v1675_v9, %v1932_v5  ;;  %v5290_v43 = vld [vmem:[#allocation30_spill] sm:$0xff] }
 0x41f   : > { %v5021_v62 = vpop.xlane.xlu0 %1914  ;;  %v3503_v18 = vpop.eup %3502  ;;  %v2462_v17 = vsel %vm1416_vm10, %v2454_v47, %v2189_v6 }
 0x420   : > { %v1934_v60 = vmul.f32 %v3503_v18, %v4996_v32  ;;  %v2457_v51 = vsel %vm387_vm1, %v1678_v34, %v1935_v44 }
 0x421   : > { %v5025_v38 = vpop.xlane.xlu1 %1911  ;;  %v3505_v20 = vpop.eup %3504 }
 0x422   : > { %v2192_v41 = vmul.f32 %v3505_v20, %v4998_v31 }
 0x423   : > { %v5029_v13 = vpop.xlane.xlu0 %2171  ;;  %v3507_v10 = vpop.eup %3506 }
 0x424   : > { %v2191_v14 = vmul.f32 %v3507_v10, %v5001_v29  ;;  %v2456_v29 = vsel %vm387_vm1, %v1677_v27, %v1934_v60 }
 0x425   : > { %v5033_v58 = vpop.xlane.xlu1 %2168  ;;  %v3509_v42 = vpop.eup %3508 }
 0x426   : > { %v1937_v2 = vmul.f32 %v3509_v42, %v5005_v56  ;;  %v2464_v4 = vsel %vm1416_vm10, %v2456_v29, %v2191_v14 }
 0x427   : > { %v2411_v21 = vpop.xlane.xlu0 %2410  ;;  %v3511_v19 = vpop.eup %3510 }
 0x428   : > { %3514 = vrcp.f32 %v2411_v21  ;;  %v1936_v57 = vmul.f32 %v3511_v19, %v5009_v8  ;;  %v2459_v20 = vsel %vm387_vm1, %v1680_v52, %v1937_v2  ;;  %v5291_v19 = vld [vmem:[#allocation14_spill] sm:$0xff]  ;;  %v1681_v2 = vmul.f32 %v5037_v30, %v4974_v49 }
 0x429   : > { %3516 = vrcp.f32 %v5017_v37  ;;  %v2408_v24 = vpop.xlane.xlu1 %2407  ;;  %v3513_v7 = vpop.eup %3512 }
 0x42a   : > { %3518 = vrcp.f32 %v2408_v24  ;;  %v2194_v0 = vmul.f32 %v3513_v7, %v5013_v40  ;;  %v2458_v33 = vsel %vm387_vm1, %v1679_v61, %v1936_v57  ;;  %v5293_v61 = vld [vmem:[#allocation13_spill] sm:$0xff]  ;;  %v5298_v57 = vld [vmem:[#allocation34_spill] sm:$0xff] }
 0x42b   : > { %3520 = vrcp.f32 %v5021_v62  ;;  %v2417_v35 = vpop.xlane.xlu0 %2416 }
 0x42c   : > { %3522 = vrcp.f32 %v2417_v35  ;;  %v2467_v27 = vsel %vm1416_vm10, %v2459_v20, %v2194_v0  ;;  %v5300_v0 = vld [vmem:[#allocation35_spill] sm:$0xff] }
 0x42d   : > { %3524 = vrcp.f32 %v5025_v38  ;;  %v5042_v26 = vpop.xlane.xlu1 %2413  ;;  %v5304_v20 = vld [vmem:[#allocation19_spill] sm:$0xff] }
 0x42e   : > { %3526 = vrcp.f32 %v5042_v26 }
 0x42f   : > { %3528 = vrcp.f32 %v5029_v13  ;;  %v5046_v1 = vpop.xlane.xlu0 %2422 }
 0x430   : > { %3530 = vrcp.f32 %v5046_v1 }
 0x431   : > { %3532 = vrcp.f32 %v5033_v58  ;;  %v5050_v59 = vpop.xlane.xlu1 %2419 }
 0x432   : > { %3534 = vrcp.f32 %v5050_v59 }
 0x433   : > { %v5057_v28 = vpop.xlane.xlu0 %2428 }
 0x434   : > { %3536 = vrcp.f32 %v5057_v28 }
 0x435   : > { %v3515_v55 = vpop.eup %3514  ;;  %v5067_v16 = vpop.xlane.xlu1 %2425 }
 0x436   : > { %v3517_v23 = vpop.eup %3516  ;;  %v2447_v15 = vmul.f32 %v3515_v55, %v2411_v21  ;;  %3538 = vrcp.f32 %v5067_v16 }
 0x437   : > { %v3519_v45 = vpop.eup %3518  ;;  %v2193_v10 = vmul.f32 %v3517_v23, %v5017_v37  ;;  %v5294_v23 = vld [vmem:[#allocation29_spill] sm:$0xff] }
 0x438   : > { %v3521_v48 = vpop.eup %3520  ;;  %v2471_v25 = vsel %vm1425_vm11, %v2463_v46, %v2447_v15  ;;  %v2446_v32 = vmul.f32 %v3519_v45, %v2408_v24  ;;  %v2465_v24 = vsel %vm1416_vm10, %v2457_v51, %v2192_v41  ;;  %v5295_v46 = vld [vmem:[#allocation16_spill] sm:$0xff] }
 0x439   : > { %v3523_v63 = vpop.eup %3522  ;;  %v2487_v21 = vmul.f32 %v2471_v25, %v5289_v54  ;;  %v1939_v5 = vmul.f32 %v3521_v48, %v5021_v62  ;;  %v2466_v60 = vsel %vm1416_vm10, %v2458_v33, %v2193_v10  ;;  %v5296_v48 = vld [vmem:[#allocation36_spill] sm:$0xff] }
 0x43a   : > { %v3525_v31 = vpop.eup %3524  ;;  %v2470_v22 = vsel %vm1425_vm11, %v2462_v17, %v2446_v32  ;;  %v2449_v56 = vmul.f32 %v3523_v63, %v2417_v35  ;;  %v5297_v63 = vld [vmem:[#allocation15_spill] sm:$0xff] }
 0x43b   : > { %v3527_v53 = vpop.eup %3526  ;;  %v2507_v36 = vmul.f32 %v4867_v3, %v2487_v21  ;;  %v2486_v18 = vmul.f32 %v2470_v22, %v5290_v43  ;;  %v1938_v62 = vmul.f32 %v3525_v31, %v5025_v38  ;;  %v2461_v38 = vsel %vm387_vm1, %v1682_v12, %v1939_v5  ;;  %v5299_v21 = vld [vmem:[#allocation18_spill] sm:$0xff]  ;;  %v5303_v43 = vld [vmem:[#allocation20_spill] sm:$0xff] }
 0x43c   : > { %v3529_v8 = vpop.eup %3528  ;;  %v2473_v40 = vsel %vm1425_vm11, %v2465_v24, %v2449_v56  ;;  %v2448_v42 = vmul.f32 %v3527_v53, %v5042_v26  ;;  %v5301_v53 = vld [vmem:[#allocation17_spill] sm:$0xff] }
 0x43d   : > { %v3531_v35 = vpop.eup %3530  ;;  %v2541_v11 = vadd.f32 %v5291_v19, %v2507_v36  ;;  %v2506_v9 = vmul.f32 %v4867_v3, %v2486_v18  ;;  %v2489_v7 = vmul.f32 %v5292_v50, %v2473_v40  ;;  %v2196_v52 = vmul.f32 %v3529_v8, %v5029_v13 }
 0x43e   : > { %v3533_v34 = vpop.eup %3532  ;;  %v2472_v37 = vsel %vm1425_vm11, %v2464_v4, %v2448_v42  ;;  %v2451_v55 = vmul.f32 %v3531_v35, %v5046_v1  ;;  %v2460_v30 = vsel %vm387_vm1, %v1681_v2, %v1938_v62  ;;  %v5302_v4 = vld [vmem:[#allocation33_spill] sm:$0xff] }
 0x43f   : > { %v3535_v26 = vpop.eup %3534  ;;  %2557 = vst.msk [vmem:[%s4902_s5 + $0x48] sm:$0xff] %vm265_vm0, %v2541_v11  ;;  %v2540_v6 = vadd.f32 %v5293_v61, %v2506_v9  ;;  %v2509_v44 = vmul.f32 %v4867_v3, %v2489_v7  ;;  %v2488_v39 = vmul.f32 %v5294_v23, %v2472_v37  ;;  %v2195_v13 = vmul.f32 %v3533_v34, %v5033_v58 }
 0x440   : > { %v2475_v15 = vsel %vm1425_vm11, %v2467_v27, %v2451_v55  ;;  %v2450_v1 = vmul.f32 %v3535_v26, %v5050_v59  ;;  %v2469_v32 = vsel %vm1416_vm10, %v2461_v38, %v2196_v52 }
 0x441   : > { %v3537_v45 = vpop.eup %3536  ;;  %2556 = vst.msk [vmem:[%s4902_s5 + $0x40] sm:$0xff] %vm265_vm0, %v2540_v6  ;;  %v2543_v41 = vadd.f32 %v5295_v46, %v2509_v44  ;;  %v2508_v14 = vmul.f32 %v4867_v3, %v2488_v39  ;;  %v2491_v47 = vmul.f32 %v2475_v15, %v5296_v48  ;;  %v2468_v54 = vsel %vm1416_vm10, %v2460_v30, %v2195_v13 }
 0x442   : > { %v2474_v25 = vsel %vm1425_vm11, %v2466_v60, %v2450_v1  ;;  %v2453_v59 = vmul.f32 %v3537_v45, %v5057_v28 }
 0x443   : > { %v3539_v58 = vpop.eup %3538  ;;  %2559 = vst.msk [vmem:[%s4902_s5 + $0x58] sm:$0xff] %vm265_vm0, %v2543_v41  ;;  %v2542_v17 = vadd.f32 %v5297_v63, %v2508_v14  ;;  %v2511_v51 = vmul.f32 %v4867_v3, %v2491_v47  ;;  %v2490_v49 = vmul.f32 %v2474_v25, %v5298_v57 }
 0x444   : > { %v2477_v12 = vsel %vm1425_vm11, %v2469_v32, %v2453_v59  ;;  %v2452_v28 = vmul.f32 %v3539_v58, %v5067_v16 }
 0x445   : > { %2558 = vst.msk [vmem:[%s4902_s5 + $0x50] sm:$0xff] %vm265_vm0, %v2542_v17  ;;  %v2545_v31 = vadd.f32 %v5299_v21, %v2511_v51  ;;  %v2510_v29 = vmul.f32 %v4867_v3, %v2490_v49  ;;  %v2493_v22 = vmul.f32 %v5300_v0, %v2477_v12 }
 0x446   : > { %v2476_v56 = vsel %vm1425_vm11, %v2468_v54, %v2452_v28 }
 0x447   : > { %2561 = vst.msk [vmem:[%s4902_s5 + $0x68] sm:$0xff] %vm265_vm0, %v2545_v31  ;;  %v2544_v24 = vadd.f32 %v5301_v53, %v2510_v29  ;;  %v2513_v16 = vmul.f32 %v4867_v3, %v2493_v22  ;;  %v2492_v36 = vmul.f32 %v5302_v4, %v2476_v56 }
 0x449   : > { %2560 = vst.msk [vmem:[%s4902_s5 + $0x60] sm:$0xff] %vm265_vm0, %v2544_v24  ;;  %v2547_v18 = vadd.f32 %v5303_v43, %v2513_v16  ;;  %v2512_v8 = vmul.f32 %v4867_v3, %v2492_v36 }
 0x44b   : > { %2563 = vst.msk [vmem:[%s4902_s5 + $0x78] sm:$0xff] %vm265_vm0, %v2547_v18  ;;  %v2546_v10 = vadd.f32 %v5304_v20, %v2512_v8 }
 0x44d   : > { %2562 = vst.msk [vmem:[%s4902_s5 + $0x70] sm:$0xff] %vm265_vm0, %v2546_v10 }
 0x44e   : > { %3615 = shalt.err (!%p3612_p0)
}
 0x44f   : > { %s3616_s13 = scalar_lea.hbm %s5153_s12, 2048  ;;  %s3620_s24 = scalar_lea.hbm %s5206_s3, 4096 }
 0x450   : > { %p3617_p5 = scmp.ne.s32.totalorder %s5153_s12, %s3616_s13  ;;  %p3621_p4 = scmp.lt.s32.totalorder %s5153_s12, %s5206_s3 }
 0x451   : > { %p3622_p6 = scmp.lt.s32.totalorder %s3620_s24, %s3616_s13 }
 0x452   : > { %p3618_p9 = pnand %p3617_p5, %p5305_p11 }
 0x453   : > { %p3623_p8 = por %p3622_p6, %p3621_p4 }
 0x454   : > { %p3619_p1 = pneg %p3618_p9 }
 0x456   : > { %p3624_p3 = pnand %p3623_p8, %p3619_p1 }
 0x458   : > { %3627 = shalt.err (!%p3624_p3)
}
 0x459   : > { %s3684_s30 = smov 128   ;;  %s3685_s4 = smov 8  }
 0x45a   : > { %3218 = dma.vmem_to_hbm [thread:$0]  (%p5305_p11), %s5155_s9, 2048, %s5153_s12, %s2565_s0, %s3684_s30, %s3684_s30, %s3685_s4  }
 0x45b PF: > { %s2594_s5 = sand.u32 1, %s3658_s14   ;;  %p5306_p7 = scmp.ne.s32.totalorder %s5235_s20, 0 }
 0x45c   : > { %p5307_p12 = scmp.ge.s32.totalorder %s3670_s17, 2  ;;  %s2595_s8 = scalar_lea.sflag [#allocation5], %s2594_s5 }
 0x45e   : > { %p3229_p10 = pnand %p5307_p12, %p5306_p7 }
 0x460   : > { %p3230_p2 = pneg %p3229_p10 }
 0x462   : > { %3653 = dma.done.wait (%p3230_p2), %s2595_s8, 2048  }
 0x463   : > { %3655 = vsyncadd (%p3230_p2), %s2595_s8, 4294965248  ;;  %p18_p13 = scmp.ge.s32.totalorder %s3763_s25, 4   ;;  %s5308_s14 = smov %s3662_s15 }
 0x464   : > { %s5309_s15 = smov %s3666_s16  ;;  %s5310_s16 = smov %s3780_s6 }
 0x465   : > { %s5311_s17 = smov %s3763_s25  ;;  %20 = sbr.rel (!%p18_p13) target bundleno = 8 (0x8), region = 81 }
 0x46a   :  { %2600 = vsyncpa [#allocation4], 1 }
 0x46b   :  { %2602 = vsyncpa [#allocation4 + $0x1], 1 }
 0x46c   :  { %2603 = vsyncpa [#allocation7], 1 }
 0x46d   :  { %2604 = vsyncpa [#allocation5], 1 }
 0x46e   :  { %2606 = vsyncpa [#allocation5 + $0x1], 1 }

</bundles_post_ra>
